<compile_context>
chip_gen: v6e
topology: v6e:2x2x1
jax: 0.10.0
libtpu: 0.0.40
codegen_flags: <defaults>
</compile_context>

<pallas_src>
import functools
import math

import jax
import jax.numpy as jnp
from jax import lax
from jax.experimental import pallas as pl
from jax.experimental.pallas import tpu as pltpu

LN_EPS = 1e-5  # nn.LayerNorm default eps


def _layernorm(x, w, b):
    mu = jnp.mean(x, axis=-1, keepdims=True)
    var = jnp.mean((x - mu) ** 2, axis=-1, keepdims=True)
    return (x - mu) * lax.rsqrt(var + LN_EPS) * w + b


def vit_block_kernel(x_ref,
                     ln1w_ref, ln1b_ref,
                     wqkv_ref, bqkv_ref,
                     ln2w_ref, ln2b_ref,
                     w1_ref, b1_ref, w2_ref, b2_ref,
                     o_ref,
                     scr_ref,                      # (S, D) f32 VMEM scratch
                     *, n_heads, heads_per_group):
    x = x_ref[0]                                   # (S, D) f32
    S, D = x.shape
    dh = D // n_heads
    gw = heads_per_group * dh                      # lane-aligned group width (>=128 when possible)
    n_groups = n_heads // heads_per_group
    inv_sqrt2 = 1.0 / math.sqrt(2.0)

    # ---- LayerNorm 1 (f32) ----
    xn = _layernorm(x, ln1w_ref[...], ln1b_ref[...])
    xnb = xn.astype(jnp.bfloat16)                  # bf16 operands for the MXU

    # ---- per-group fused (block-diagonal) QKV projection + per-head attention ----
    # wqkv_ref: (n_groups, gw, 3*gw) bf16 with column layout [q_grp | k_grp | v_grp]
    # (1/sqrt(dh) already folded into the Q columns / Q bias at weight-prep time).
    for g in range(n_groups):                      # static python loop, n_groups small
        lo = g * gw
        seq = xnb[:, lo:lo + gw]                                        # (S, gw) bf16
        qkv = jnp.dot(seq, wqkv_ref[g],
                      preferred_element_type=jnp.float32)               # (S, 3*gw) f32 acc
        qkv = qkv + bqkv_ref[g]                                         # (1, 3*gw) broadcast
        q = qkv[:, 0 * gw:1 * gw].astype(jnp.bfloat16)
        k = qkv[:, 1 * gw:2 * gw].astype(jnp.bfloat16)
        v = qkv[:, 2 * gw:3 * gw].astype(jnp.bfloat16)
        head_outs = []
        for j in range(heads_per_group):
            a = j * dh
            qh = q[:, a:a + dh]
            kh = k[:, a:a + dh]
            vh = v[:, a:a + dh]
            # QK^T with the transpose folded into the contraction (no k.T relayout).
            s = lax.dot_general(qh, kh, (((1,), (1,)), ((), ())),
                                preferred_element_type=jnp.float32)     # (S, S) f32
            s = s - jnp.max(s, axis=-1, keepdims=True)
            p = jnp.exp(s)
            p = p * pl.reciprocal(jnp.sum(p, axis=-1, keepdims=True), approx=True)
            head_outs.append(jnp.dot(p.astype(jnp.bfloat16), vh,
                                     preferred_element_type=jnp.float32))
        blk = head_outs[0] if len(head_outs) == 1 else jnp.concatenate(head_outs, axis=-1)
        scr_ref[:, lo:lo + gw] = blk               # full-width (lane-dense) store

    out1 = x + scr_ref[...]                        # residual 1

    # ---- LayerNorm 2 ----
    on = _layernorm(out1, ln2w_ref[...], ln2b_ref[...])
    onb = on.astype(jnp.bfloat16)

    # ---- MLP: Linear(D, 4D) -> exact erf GELU -> Linear(4D, D), residual 2 ----
    # w1_ref: (n_chunks, D, chunk)  b1_ref: (n_chunks, 1, chunk)  w2_ref: (n_chunks, chunk, D)
    n_chunks = w1_ref.shape[0]
    if n_chunks == 1:
        # single-shot MLP (preferred whenever the (S, 4D) intermediate fits VMEM)
        hpre = jnp.dot(onb, w1_ref[0], preferred_element_type=jnp.float32) + b1_ref[0]
        hg = 0.5 * hpre * (1.0 + lax.erf(hpre * inv_sqrt2))
        o_ref[0] = out1 + b2_ref[...] + jnp.dot(hg.astype(jnp.bfloat16), w2_ref[0],
                                                preferred_element_type=jnp.float32)
    else:
        # static (unrolled) chunk loop, accumulating into the VMEM scratch (no carry spill)
        scr_ref[...] = out1 + b2_ref[...]
        for c in range(n_chunks):
            hpre = jnp.dot(onb, w1_ref[c], preferred_element_type=jnp.float32) + b1_ref[c]
            hg = 0.5 * hpre * (1.0 + lax.erf(hpre * inv_sqrt2))
            scr_ref[...] += jnp.dot(hg.astype(jnp.bfloat16), w2_ref[c],
                                    preferred_element_type=jnp.float32)
        o_ref[0] = scr_ref[...]


def _physical_vmem_bytes():
    try:
        return int(pltpu.get_tpu_info().vmem_capacity_bytes)
    except Exception:
        return 64 * 1024 * 1024     # conservative per-TensorCore floor (v7x)


def vit_block(x, params, n_heads, mlp_chunk=None):
    B, S, D = x.shape
    H = n_heads
    dh = D // H
    Dm = params["w1"].shape[1]

    # --- head grouping: pack heads into 128-lane groups when possible ---
    if dh < 128 and 128 % dh == 0 and H % (128 // dh) == 0:
        heads_per_group = 128 // dh
    else:
        heads_per_group = 1
    gw = heads_per_group * dh
    n_groups = H // heads_per_group

    # --- fused block-diagonal per-group QKV weights, layout [q_grp | k_grp | v_grp] ---
    # 1/sqrt(dh) folded into the Q weights & bias (exactly equivalent to scaling QK^T).
    scale = 1.0 / math.sqrt(dh)
    wq, bq = params["qw"] * scale, params["qb"] * scale
    wk, bk = params["kw"], params["kb"]
    wv, bv = params["vw"], params["vb"]
    wqkv = jnp.zeros((n_groups, gw, 3 * gw), jnp.float32)
    bqkv = jnp.zeros((n_groups, 1, 3 * gw), jnp.float32)
    for g in range(n_groups):
        for j in range(heads_per_group):
            h = g * heads_per_group + j
            r = slice(j * dh, (j + 1) * dh)
            wqkv = wqkv.at[g, r, 0 * gw + j * dh:0 * gw + (j + 1) * dh].set(wq[h])
            wqkv = wqkv.at[g, r, 1 * gw + j * dh:1 * gw + (j + 1) * dh].set(wk[h])
            wqkv = wqkv.at[g, r, 2 * gw + j * dh:2 * gw + (j + 1) * dh].set(wv[h])
            bqkv = bqkv.at[g, 0, 0 * gw + j * dh:0 * gw + (j + 1) * dh].set(bq[h])
            bqkv = bqkv.at[g, 0, 1 * gw + j * dh:1 * gw + (j + 1) * dh].set(bk[h])
            bqkv = bqkv.at[g, 0, 2 * gw + j * dh:2 * gw + (j + 1) * dh].set(bv[h])
    wqkv = wqkv.astype(jnp.bfloat16)

    # --- VMEM budget (re-derived per-generation) and MLP chunk selection ---
    phys = _physical_vmem_bytes()
    budget = max(phys - (8 << 20), 32 << 20)       # physical minus headroom

    def _estimate_vmem(chunk):
        bf16, f32 = 2, 4
        weights = (wqkv.size * bf16 + bqkv.size * f32
                   + 2 * D * Dm * bf16             # w1 + w2
                   + Dm * f32 + 5 * D * f32)       # b1 + ln1/ln2/b2 vectors
        weights *= 2                               # worst case: double-buffered weights
        acts = 2 * 2 * S * D * f32                 # x + out blocks, double-buffered
        scratch = S * D * f32
        live = (S * chunk * (f32 + bf16)           # MLP intermediate
                + 6 * S * D * f32                  # xn / out1 / on temporaries
                + 3 * S * gw * f32 + 2 * S * S * f32)
        return weights + acts + scratch + live + (4 << 20)

    if mlp_chunk is None:
        mlp_chunk = Dm                              # single-shot MLP preferred
        while (_estimate_vmem(mlp_chunk) > budget
               and mlp_chunk % 2 == 0 and (mlp_chunk // 2) % 128 == 0):
            mlp_chunk //= 2
    mlp_chunk = min(mlp_chunk, Dm)
    assert Dm % mlp_chunk == 0, "mlp dim must be divisible by the MLP chunk size"
    n_chunks = Dm // mlp_chunk
    vmem_limit = int(min(max(_estimate_vmem(mlp_chunk), 32 << 20), budget))

    # --- pre-chunk the MLP weights so the kernel only indexes a leading (non-lane) axis ---
    w1c = (params["w1"].astype(jnp.bfloat16)
           .reshape(D, n_chunks, mlp_chunk).transpose(1, 0, 2))      # (nc, D, chunk)
    b1c = (params["b1"].astype(jnp.float32)
           .reshape(1, n_chunks, mlp_chunk).transpose(1, 0, 2))      # (nc, 1, chunk)
    w2c = params["w2"].astype(jnp.bfloat16).reshape(n_chunks, mlp_chunk, D)  # (nc, chunk, D)

    kernel = functools.partial(vit_block_kernel, n_heads=n_heads,
                               heads_per_group=heads_per_group)

    def _run(single_buffer_weights):
        def wspec(shape):
            n = len(shape)
            idx = lambda b, _n=n: (0,) * _n
            if single_buffer_weights:
                # grid-invariant weights: don't pay for a second pipeline buffer
                return pl.BlockSpec(shape, idx, pipeline_mode=pl.Buffered(1))
            return pl.BlockSpec(shape, idx)

        in_specs = [
            pl.BlockSpec((1, S, D), lambda b: (b, 0, 0)),   # x
            wspec((1, D)), wspec((1, D)),                   # ln1 w, b
            wspec((n_groups, gw, 3 * gw)),                  # fused per-group qkv w
            wspec((n_groups, 1, 3 * gw)),                   # fused per-group qkv b
            wspec((1, D)), wspec((1, D)),                   # ln2 w, b
            wspec((n_chunks, D, mlp_chunk)),                # mlp w1 (chunked)
            wspec((n_chunks, 1, mlp_chunk)),                # mlp b1 (chunked)
            wspec((n_chunks, mlp_chunk, D)),                # mlp w2 (chunked)
            wspec((1, D)),                                  # mlp b2
        ]

        out = pl.pallas_call(
            kernel,
            out_shape=jax.ShapeDtypeStruct((B, S, D), jnp.float32),
            grid_spec=pltpu.PrefetchScalarGridSpec(
                num_scalar_prefetch=0,
                grid=(B,),
                in_specs=in_specs,
                out_specs=pl.BlockSpec((1, S, D), lambda b: (b, 0, 0)),
                scratch_shapes=[pltpu.VMEM((S, D), jnp.float32)],
            ),
            compiler_params=pltpu.CompilerParams(
                dimension_semantics=("parallel",),  # batch items independent -> megacore
                vmem_limit_bytes=vmem_limit),
        )(
            x,
            params["ln1_w"], params["ln1_b"],
            wqkv, bqkv,
            params["ln2_w"], params["ln2_b"],
            w1c, b1c, w2c, params["b2"],
        )
        return jax.block_until_ready(out)

    try:
        return _run(True)
    except Exception:
        # fall back to default (double-buffered) weight specs if pl.Buffered(1)
        # is not supported by the installed JAX / Mosaic version
        return _run(False)


def init_params(key, hidden_d, n_heads, mlp_ratio=4):
    dh = hidden_d // n_heads
    dm = mlp_ratio * hidden_d
    ks = jax.random.split(key, 10)
    scale = 0.02
    return {
        # nn.LayerNorm defaults: weight=1, bias=0
        "ln1_w": jnp.ones((1, hidden_d), jnp.float32),
        "ln1_b": jnp.zeros((1, hidden_d), jnp.float32),
        "ln2_w": jnp.ones((1, hidden_d), jnp.float32),
        "ln2_b": jnp.zeros((1, hidden_d), jnp.float32),
        # per-head Q/K/V Linear(d_head, d_head), stored (in, out)
        "qw": scale * jax.random.normal(ks[0], (n_heads, dh, dh), jnp.float32),
        "qb": scale * jax.random.normal(ks[1], (n_heads, dh), jnp.float32),
        "kw": scale * jax.random.normal(ks[2], (n_heads, dh, dh), jnp.float32),
        "kb": scale * jax.random.normal(ks[3], (n_heads, dh), jnp.float32),
        "vw": scale * jax.random.normal(ks[4], (n_heads, dh, dh), jnp.float32),
        "vb": scale * jax.random.normal(ks[5], (n_heads, dh), jnp.float32),
        # MLP Linear weights stored (in, out)
        "w1": scale * jax.random.normal(ks[6], (hidden_d, dm), jnp.float32),
        "b1": scale * jax.random.normal(ks[7], (1, dm), jnp.float32),
        "w2": scale * jax.random.normal(ks[8], (dm, hidden_d), jnp.float32),
        "b2": scale * jax.random.normal(ks[9], (1, hidden_d), jnp.float32),
    }


def vit_block_ref(x, params, n_heads):
    """Pure-JAX f32 reference matching the PyTorch module semantics."""
    def ln(y, w, b):
        mu = y.mean(-1, keepdims=True)
        var = ((y - mu) ** 2).mean(-1, keepdims=True)
        return (y - mu) / jnp.sqrt(var + LN_EPS) * w + b

    B, S, D = x.shape
    dh = D // n_heads
    xn = ln(x, params["ln1_w"], params["ln1_b"])
    heads = []
    for h in range(n_heads):
        seq = xn[..., h * dh:(h + 1) * dh]
        q = seq @ params["qw"][h] + params["qb"][h]
        k = seq @ params["kw"][h] + params["kb"][h]
        v = seq @ params["vw"][h] + params["vb"][h]
        s = (q @ jnp.swapaxes(k, -1, -2)) / math.sqrt(dh)
        p = jax.nn.softmax(s, axis=-1)
        heads.append(p @ v)
    out1 = x + jnp.concatenate(heads, axis=-1)
    on = ln(out1, params["ln2_w"], params["ln2_b"])
    h1 = on @ params["w1"] + params["b1"]
    g = 0.5 * h1 * (1.0 + lax.erf(h1 / math.sqrt(2.0)))
    return out1 + g @ params["w2"] + params["b2"]


if __name__ == "__main__":
    # Small but lane-dense demo shapes: D multiple of 128, S multiple of 8.
    # (Tune/benchmark at real ViT shapes, e.g. S~200, D=768, H=12.)
    B, S, D, H = 2, 8, 128, 2
    key = jax.random.PRNGKey(0)
    kx, kp = jax.random.split(key)
    x = jax.random.normal(kx, (B, S, D), jnp.float32)
    params = init_params(kp, D, H, mlp_ratio=4)

    out = vit_block(x, params, n_heads=H)
    jax.block_until_ready(out)
    assert out.shape == (B, S, D)

    ref = vit_block_ref(x, params, n_heads=H)
    assert jnp.allclose(out, ref, rtol=3e-2, atol=3e-2), float(jnp.max(jnp.abs(out - ref)))
    print("KERNEL_OK")
</pallas_src>

<mosaic_0001>
module attributes {stable_mosaic.version = 11 : i64} {
  func.func @vit_block_kernel(%arg0: i32, %arg1: memref<1x8x128xf32, #tpu.memory_space<vmem>>, %arg2: memref<1x128xf32, #tpu.memory_space<vmem>>, %arg3: memref<1x128xf32, #tpu.memory_space<vmem>>, %arg4: memref<1x128x384xbf16, #tpu.memory_space<vmem>>, %arg5: memref<1x1x384xf32, #tpu.memory_space<vmem>>, %arg6: memref<1x128xf32, #tpu.memory_space<vmem>>, %arg7: memref<1x128xf32, #tpu.memory_space<vmem>>, %arg8: memref<1x128x512xbf16, #tpu.memory_space<vmem>>, %arg9: memref<1x1x512xf32, #tpu.memory_space<vmem>>, %arg10: memref<1x512x128xbf16, #tpu.memory_space<vmem>>, %arg11: memref<1x128xf32, #tpu.memory_space<vmem>>, %arg12: memref<1x8x128xf32, #tpu.memory_space<vmem>>, %arg13: memref<8x128xf32, #tpu.memory_space<vmem>>) attributes {dimension_semantics = [#tpu.dimension_semantics<parallel>], iteration_bounds = array<i64: 2>, scalar_prefetch = 0 : i64, scratch_operands = 1 : i64, tpu.core_type = #tpu.core_type<tc>, window_params = [{transform_indices = @transform_0, window_bounds = array<i64: 1, 8, 128>}, {pipeline_mode = #tpu.pipeline_mode<synchronous>, transform_indices = @transform_1, window_bounds = array<i64: 1, 128>}, {pipeline_mode = #tpu.pipeline_mode<synchronous>, transform_indices = @transform_2, window_bounds = array<i64: 1, 128>}, {pipeline_mode = #tpu.pipeline_mode<synchronous>, transform_indices = @transform_3, window_bounds = array<i64: 1, 128, 384>}, {pipeline_mode = #tpu.pipeline_mode<synchronous>, transform_indices = @transform_4, window_bounds = array<i64: 1, 1, 384>}, {pipeline_mode = #tpu.pipeline_mode<synchronous>, transform_indices = @transform_5, window_bounds = array<i64: 1, 128>}, {pipeline_mode = #tpu.pipeline_mode<synchronous>, transform_indices = @transform_6, window_bounds = array<i64: 1, 128>}, {pipeline_mode = #tpu.pipeline_mode<synchronous>, transform_indices = @transform_7, window_bounds = array<i64: 1, 128, 512>}, {pipeline_mode = #tpu.pipeline_mode<synchronous>, transform_indices = @transform_8, window_bounds = array<i64: 1, 1, 512>}, {pipeline_mode = #tpu.pipeline_mode<synchronous>, transform_indices = @transform_9, window_bounds = array<i64: 1, 512, 128>}, {pipeline_mode = #tpu.pipeline_mode<synchronous>, transform_indices = @transform_10, window_bounds = array<i64: 1, 128>}, {transform_indices = @transform_11, window_bounds = array<i64: 1, 8, 128>}]} {
    %c0 = arith.constant 0 : index
    %c0_0 = arith.constant 0 : index
    %c0_1 = arith.constant 0 : index
    %0 = vector.load %arg1[%c0, %c0_0, %c0_1] : memref<1x8x128xf32, #tpu.memory_space<vmem>>, vector<1x8x128xf32>
    %1 = vector.shape_cast %0 : vector<1x8x128xf32> to vector<8x128xf32>
    %c0_2 = arith.constant 0 : index
    %c0_3 = arith.constant 0 : index
    %2 = vector.load %arg2[%c0_2, %c0_3] : memref<1x128xf32, #tpu.memory_space<vmem>>, vector<1x128xf32>
    %c0_4 = arith.constant 0 : index
    %c0_5 = arith.constant 0 : index
    %3 = vector.load %arg3[%c0_4, %c0_5] : memref<1x128xf32, #tpu.memory_space<vmem>>, vector<1x128xf32>
    %cst = arith.constant dense<0.000000e+00> : vector<8xf32>
    %4 = vector.multi_reduction <add>, %1, %cst [1] : vector<8x128xf32> to vector<8xf32>
    %5 = vector.shape_cast %4 : vector<8xf32> to vector<8x1xf32>
    %cst_6 = arith.constant 1.280000e+02 : f32
    %6 = vector.broadcast %cst_6 : f32 to vector<8x1xf32>
    %7 = arith.divf %5, %6 : vector<8x1xf32>
    %8 = vector.broadcast %7 : vector<8x1xf32> to vector<8x128xf32>
    %9 = arith.subf %1, %8 : vector<8x128xf32>
    %10 = arith.mulf %9, %9 : vector<8x128xf32>
    %cst_7 = arith.constant dense<0.000000e+00> : vector<8xf32>
    %11 = vector.multi_reduction <add>, %10, %cst_7 [1] : vector<8x128xf32> to vector<8xf32>
    %12 = vector.shape_cast %11 : vector<8xf32> to vector<8x1xf32>
    %cst_8 = arith.constant 1.280000e+02 : f32
    %13 = vector.broadcast %cst_8 : f32 to vector<8x1xf32>
    %14 = arith.divf %12, %13 : vector<8x1xf32>
    %15 = vector.broadcast %7 : vector<8x1xf32> to vector<8x128xf32>
    %16 = arith.subf %1, %15 : vector<8x128xf32>
    %cst_9 = arith.constant 9.99999974E-6 : f32
    %17 = vector.broadcast %cst_9 : f32 to vector<8x1xf32>
    %18 = arith.addf %14, %17 : vector<8x1xf32>
    %19 = math.rsqrt %18 : vector<8x1xf32>
    %20 = vector.broadcast %19 : vector<8x1xf32> to vector<8x128xf32>
    %21 = arith.mulf %16, %20 : vector<8x128xf32>
    %22 = vector.broadcast %2 : vector<1x128xf32> to vector<8x128xf32>
    %23 = arith.mulf %21, %22 : vector<8x128xf32>
    %24 = vector.broadcast %3 : vector<1x128xf32> to vector<8x128xf32>
    %25 = arith.addf %23, %24 : vector<8x128xf32>
    %26 = arith.truncf %25 : vector<8x128xf32> to vector<8x128xbf16>
    %c0_10 = arith.constant 0 : index
    %c0_11 = arith.constant 0 : index
    %c0_12 = arith.constant 0 : index
    %27 = vector.load %arg4[%c0_10, %c0_11, %c0_12] : memref<1x128x384xbf16, #tpu.memory_space<vmem>>, vector<1x128x384xbf16>
    %28 = vector.shape_cast %27 : vector<1x128x384xbf16> to vector<128x384xbf16>
    %cst_13 = arith.constant dense<0.000000e+00> : vector<8x384xf32>
    %29 = tpu.matmul %26, %28, %cst_13 {dimension_numbers = #tpu.dot_dimension_numbers<[1], [0], [0], [1], [0, 0, 1, 1], [], []>} : vector<8x128xbf16>, vector<128x384xbf16>, vector<8x384xf32> -> vector<8x384xf32>
    %c0_14 = arith.constant 0 : index
    %c0_15 = arith.constant 0 : index
    %c0_16 = arith.constant 0 : index
    %30 = vector.load %arg5[%c0_14, %c0_15, %c0_16] : memref<1x1x384xf32, #tpu.memory_space<vmem>>, vector<1x1x384xf32>
    %31 = vector.shape_cast %30 : vector<1x1x384xf32> to vector<1x384xf32>
    %32 = vector.broadcast %31 : vector<1x384xf32> to vector<8x384xf32>
    %33 = arith.addf %29, %32 : vector<8x384xf32>
    %34 = vector.extract_strided_slice %33 {offsets = [0, 0], sizes = [8, 128], strides = [1, 1]} : vector<8x384xf32> to vector<8x128xf32>
    %35 = arith.truncf %34 : vector<8x128xf32> to vector<8x128xbf16>
    %36 = vector.extract_strided_slice %33 {offsets = [0, 128], sizes = [8, 128], strides = [1, 1]} : vector<8x384xf32> to vector<8x128xf32>
    %37 = arith.truncf %36 : vector<8x128xf32> to vector<8x128xbf16>
    %38 = vector.extract_strided_slice %33 {offsets = [0, 256], sizes = [8, 128], strides = [1, 1]} : vector<8x384xf32> to vector<8x128xf32>
    %39 = arith.truncf %38 : vector<8x128xf32> to vector<8x128xbf16>
    %40 = vector.extract_strided_slice %35 {offsets = [0, 0], sizes = [8, 64], strides = [1, 1]} : vector<8x128xbf16> to vector<8x64xbf16>
    %41 = vector.extract_strided_slice %37 {offsets = [0, 0], sizes = [8, 64], strides = [1, 1]} : vector<8x128xbf16> to vector<8x64xbf16>
    %42 = vector.extract_strided_slice %39 {offsets = [0, 0], sizes = [8, 64], strides = [1, 1]} : vector<8x128xbf16> to vector<8x64xbf16>
    %cst_17 = arith.constant dense<0.000000e+00> : vector<8x8xf32>
    %43 = tpu.matmul %40, %41, %cst_17 {dimension_numbers = #tpu.dot_dimension_numbers<[1], [1], [0], [0], [0, 0, 1, 0], [], []>} : vector<8x64xbf16>, vector<8x64xbf16>, vector<8x8xf32> -> vector<8x8xf32>
    %cst_18 = arith.constant dense<0xFF800000> : vector<8xf32>
    %44 = vector.multi_reduction <maximumf>, %43, %cst_18 [1] : vector<8x8xf32> to vector<8xf32>
    %45 = vector.shape_cast %44 : vector<8xf32> to vector<8x1xf32>
    %46 = vector.broadcast %45 : vector<8x1xf32> to vector<8x8xf32>
    %47 = arith.subf %43, %46 : vector<8x8xf32>
    %48 = math.exp %47 : vector<8x8xf32>
    %cst_19 = arith.constant dense<0.000000e+00> : vector<8xf32>
    %49 = vector.multi_reduction <add>, %48, %cst_19 [1] : vector<8x8xf32> to vector<8xf32>
    %50 = vector.shape_cast %49 : vector<8xf32> to vector<8x1xf32>
    %51 = tpu.reciprocal %50 {approx = true} : vector<8x1xf32> -> vector<8x1xf32>
    %52 = vector.broadcast %51 : vector<8x1xf32> to vector<8x8xf32>
    %53 = arith.mulf %48, %52 : vector<8x8xf32>
    %54 = arith.truncf %53 : vector<8x8xf32> to vector<8x8xbf16>
    %cst_20 = arith.constant dense<0.000000e+00> : vector<8x64xf32>
    %55 = tpu.matmul %54, %42, %cst_20 {dimension_numbers = #tpu.dot_dimension_numbers<[1], [0], [0], [1], [0, 0, 1, 1], [], []>} : vector<8x8xbf16>, vector<8x64xbf16>, vector<8x64xf32> -> vector<8x64xf32>
    %56 = vector.extract_strided_slice %35 {offsets = [0, 64], sizes = [8, 64], strides = [1, 1]} : vector<8x128xbf16> to vector<8x64xbf16>
    %57 = vector.extract_strided_slice %37 {offsets = [0, 64], sizes = [8, 64], strides = [1, 1]} : vector<8x128xbf16> to vector<8x64xbf16>
    %58 = vector.extract_strided_slice %39 {offsets = [0, 64], sizes = [8, 64], strides = [1, 1]} : vector<8x128xbf16> to vector<8x64xbf16>
    %cst_21 = arith.constant dense<0.000000e+00> : vector<8x8xf32>
    %59 = tpu.matmul %56, %57, %cst_21 {dimension_numbers = #tpu.dot_dimension_numbers<[1], [1], [0], [0], [0, 0, 1, 0], [], []>} : vector<8x64xbf16>, vector<8x64xbf16>, vector<8x8xf32> -> vector<8x8xf32>
    %cst_22 = arith.constant dense<0xFF800000> : vector<8xf32>
    %60 = vector.multi_reduction <maximumf>, %59, %cst_22 [1] : vector<8x8xf32> to vector<8xf32>
    %61 = vector.shape_cast %60 : vector<8xf32> to vector<8x1xf32>
    %62 = vector.broadcast %61 : vector<8x1xf32> to vector<8x8xf32>
    %63 = arith.subf %59, %62 : vector<8x8xf32>
    %64 = math.exp %63 : vector<8x8xf32>
    %cst_23 = arith.constant dense<0.000000e+00> : vector<8xf32>
    %65 = vector.multi_reduction <add>, %64, %cst_23 [1] : vector<8x8xf32> to vector<8xf32>
    %66 = vector.shape_cast %65 : vector<8xf32> to vector<8x1xf32>
    %67 = tpu.reciprocal %66 {approx = true} : vector<8x1xf32> -> vector<8x1xf32>
    %68 = vector.broadcast %67 : vector<8x1xf32> to vector<8x8xf32>
    %69 = arith.mulf %64, %68 : vector<8x8xf32>
    %70 = arith.truncf %69 : vector<8x8xf32> to vector<8x8xbf16>
    %cst_24 = arith.constant dense<0.000000e+00> : vector<8x64xf32>
    %71 = tpu.matmul %70, %58, %cst_24 {dimension_numbers = #tpu.dot_dimension_numbers<[1], [0], [0], [1], [0, 0, 1, 1], [], []>} : vector<8x8xbf16>, vector<8x64xbf16>, vector<8x64xf32> -> vector<8x64xf32>
    %72 = tpu.concatenate %55, %71 in 1 : vector<8x64xf32>, vector<8x64xf32> -> vector<8x128xf32>
    %c0_25 = arith.constant 0 : index
    %c0_26 = arith.constant 0 : index
    %73 = vector.load %arg13[%c0_25, %c0_26] : memref<8x128xf32, #tpu.memory_space<vmem>>, vector<8x128xf32>
    tpu.vector_store %arg13[%c0_25, %c0_26], %72 {strides = array<i32>} : memref<8x128xf32, #tpu.memory_space<vmem>>, vector<8x128xf32>,
    %c0_27 = arith.constant 0 : index
    %c0_28 = arith.constant 0 : index
    %74 = vector.load %arg13[%c0_27, %c0_28] : memref<8x128xf32, #tpu.memory_space<vmem>>, vector<8x128xf32>
    %75 = arith.addf %1, %74 : vector<8x128xf32>
    %c0_29 = arith.constant 0 : index
    %c0_30 = arith.constant 0 : index
    %76 = vector.load %arg6[%c0_29, %c0_30] : memref<1x128xf32, #tpu.memory_space<vmem>>, vector<1x128xf32>
    %c0_31 = arith.constant 0 : index
    %c0_32 = arith.constant 0 : index
    %77 = vector.load %arg7[%c0_31, %c0_32] : memref<1x128xf32, #tpu.memory_space<vmem>>, vector<1x128xf32>
    %cst_33 = arith.constant dense<0.000000e+00> : vector<8xf32>
    %78 = vector.multi_reduction <add>, %75, %cst_33 [1] : vector<8x128xf32> to vector<8xf32>
    %79 = vector.shape_cast %78 : vector<8xf32> to vector<8x1xf32>
    %cst_34 = arith.constant 1.280000e+02 : f32
    %80 = vector.broadcast %cst_34 : f32 to vector<8x1xf32>
    %81 = arith.divf %79, %80 : vector<8x1xf32>
    %82 = vector.broadcast %81 : vector<8x1xf32> to vector<8x128xf32>
    %83 = arith.subf %75, %82 : vector<8x128xf32>
    %84 = arith.mulf %83, %83 : vector<8x128xf32>
    %cst_35 = arith.constant dense<0.000000e+00> : vector<8xf32>
    %85 = vector.multi_reduction <add>, %84, %cst_35 [1] : vector<8x128xf32> to vector<8xf32>
    %86 = vector.shape_cast %85 : vector<8xf32> to vector<8x1xf32>
    %cst_36 = arith.constant 1.280000e+02 : f32
    %87 = vector.broadcast %cst_36 : f32 to vector<8x1xf32>
    %88 = arith.divf %86, %87 : vector<8x1xf32>
    %89 = vector.broadcast %81 : vector<8x1xf32> to vector<8x128xf32>
    %90 = arith.subf %75, %89 : vector<8x128xf32>
    %cst_37 = arith.constant 9.99999974E-6 : f32
    %91 = vector.broadcast %cst_37 : f32 to vector<8x1xf32>
    %92 = arith.addf %88, %91 : vector<8x1xf32>
    %93 = math.rsqrt %92 : vector<8x1xf32>
    %94 = vector.broadcast %93 : vector<8x1xf32> to vector<8x128xf32>
    %95 = arith.mulf %90, %94 : vector<8x128xf32>
    %96 = vector.broadcast %76 : vector<1x128xf32> to vector<8x128xf32>
    %97 = arith.mulf %95, %96 : vector<8x128xf32>
    %98 = vector.broadcast %77 : vector<1x128xf32> to vector<8x128xf32>
    %99 = arith.addf %97, %98 : vector<8x128xf32>
    %100 = arith.truncf %99 : vector<8x128xf32> to vector<8x128xbf16>
    %c0_38 = arith.constant 0 : index
    %c0_39 = arith.constant 0 : index
    %c0_40 = arith.constant 0 : index
    %101 = vector.load %arg8[%c0_38, %c0_39, %c0_40] : memref<1x128x512xbf16, #tpu.memory_space<vmem>>, vector<1x128x512xbf16>
    %102 = vector.shape_cast %101 : vector<1x128x512xbf16> to vector<128x512xbf16>
    %cst_41 = arith.constant dense<0.000000e+00> : vector<8x512xf32>
    %103 = tpu.matmul %100, %102, %cst_41 {dimension_numbers = #tpu.dot_dimension_numbers<[1], [0], [0], [1], [0, 0, 1, 1], [], []>} : vector<8x128xbf16>, vector<128x512xbf16>, vector<8x512xf32> -> vector<8x512xf32>
    %c0_42 = arith.constant 0 : index
    %c0_43 = arith.constant 0 : index
    %c0_44 = arith.constant 0 : index
    %104 = vector.load %arg9[%c0_42, %c0_43, %c0_44] : memref<1x1x512xf32, #tpu.memory_space<vmem>>, vector<1x1x512xf32>
    %105 = vector.shape_cast %104 : vector<1x1x512xf32> to vector<1x512xf32>
    %106 = vector.broadcast %105 : vector<1x512xf32> to vector<8x512xf32>
    %107 = arith.addf %103, %106 : vector<8x512xf32>
    %cst_45 = arith.constant 5.000000e-01 : f32
    %108 = vector.broadcast %cst_45 : f32 to vector<8x512xf32>
    %109 = arith.mulf %108, %107 : vector<8x512xf32>
    %cst_46 = arith.constant 0.707106769 : f32
    %110 = vector.broadcast %cst_46 : f32 to vector<8x512xf32>
    %111 = arith.mulf %107, %110 : vector<8x512xf32>
    %112 = math.erf %111 : vector<8x512xf32>
    %cst_47 = arith.constant 1.000000e+00 : f32
    %113 = vector.broadcast %cst_47 : f32 to vector<8x512xf32>
    %114 = arith.addf %113, %112 : vector<8x512xf32>
    %115 = arith.mulf %109, %114 : vector<8x512xf32>
    %c0_48 = arith.constant 0 : index
    %c0_49 = arith.constant 0 : index
    %116 = vector.load %arg11[%c0_48, %c0_49] : memref<1x128xf32, #tpu.memory_space<vmem>>, vector<1x128xf32>
    %117 = vector.broadcast %116 : vector<1x128xf32> to vector<8x128xf32>
    %118 = arith.addf %75, %117 : vector<8x128xf32>
    %119 = arith.truncf %115 : vector<8x512xf32> to vector<8x512xbf16>
    %c0_50 = arith.constant 0 : index
    %c0_51 = arith.constant 0 : index
    %c0_52 = arith.constant 0 : index
    %120 = vector.load %arg10[%c0_50, %c0_51, %c0_52] : memref<1x512x128xbf16, #tpu.memory_space<vmem>>, vector<1x512x128xbf16>
    %121 = vector.shape_cast %120 : vector<1x512x128xbf16> to vector<512x128xbf16>
    %cst_53 = arith.constant dense<0.000000e+00> : vector<8x128xf32>
    %122 = tpu.matmul %119, %121, %cst_53 {dimension_numbers = #tpu.dot_dimension_numbers<[1], [0], [0], [1], [0, 0, 1, 1], [], []>} : vector<8x512xbf16>, vector<512x128xbf16>, vector<8x128xf32> -> vector<8x128xf32>
    %123 = arith.addf %118, %122 : vector<8x128xf32>
    %c0_54 = arith.constant 0 : index
    %c0_55 = arith.constant 0 : index
    %c0_56 = arith.constant 0 : index
    %124 = vector.load %arg12[%c0_54, %c0_55, %c0_56] : memref<1x8x128xf32, #tpu.memory_space<vmem>>, vector<1x8x128xf32>
    %125 = vector.shape_cast %124 : vector<1x8x128xf32> to vector<8x128xf32>
    %126 = vector.shape_cast %123 : vector<8x128xf32> to vector<1x8x128xf32>
    tpu.vector_store %arg12[%c0_54, %c0_55, %c0_56], %126 {strides = array<i32>} : memref<1x8x128xf32, #tpu.memory_space<vmem>>, vector<1x8x128xf32>,
    return
  }
  func.func @transform_0(%arg0: i32) -> (i32, i32, i32) {
    %c0_i32 = arith.constant 0 : i32
    %c0_i32_0 = arith.constant 0 : i32
    %c0_i32_1 = arith.constant 0 : i32
    return %arg0, %c0_i32, %c0_i32_0 : i32, i32, i32
  }
  func.func @transform_1(%arg0: i32) -> (i32, i32) {
    %c0_i32 = arith.constant 0 : i32
    %c0_i32_0 = arith.constant 0 : i32
    %c0_i32_1 = arith.constant 0 : i32
    return %c0_i32, %c0_i32_0 : i32, i32
  }
  func.func @transform_2(%arg0: i32) -> (i32, i32) {
    %c0_i32 = arith.constant 0 : i32
    %c0_i32_0 = arith.constant 0 : i32
    %c0_i32_1 = arith.constant 0 : i32
    return %c0_i32, %c0_i32_0 : i32, i32
  }
  func.func @transform_3(%arg0: i32) -> (i32, i32, i32) {
    %c0_i32 = arith.constant 0 : i32
    %c0_i32_0 = arith.constant 0 : i32
    %c0_i32_1 = arith.constant 0 : i32
    %c0_i32_2 = arith.constant 0 : i32
    return %c0_i32, %c0_i32_0, %c0_i32_1 : i32, i32, i32
  }
  func.func @transform_4(%arg0: i32) -> (i32, i32, i32) {
    %c0_i32 = arith.constant 0 : i32
    %c0_i32_0 = arith.constant 0 : i32
    %c0_i32_1 = arith.constant 0 : i32
    %c0_i32_2 = arith.constant 0 : i32
    return %c0_i32, %c0_i32_0, %c0_i32_1 : i32, i32, i32
  }
  func.func @transform_5(%arg0: i32) -> (i32, i32) {
    %c0_i32 = arith.constant 0 : i32
    %c0_i32_0 = arith.constant 0 : i32
    %c0_i32_1 = arith.constant 0 : i32
    return %c0_i32, %c0_i32_0 : i32, i32
  }
  func.func @transform_6(%arg0: i32) -> (i32, i32) {
    %c0_i32 = arith.constant 0 : i32
    %c0_i32_0 = arith.constant 0 : i32
    %c0_i32_1 = arith.constant 0 : i32
    return %c0_i32, %c0_i32_0 : i32, i32
  }
  func.func @transform_7(%arg0: i32) -> (i32, i32, i32) {
    %c0_i32 = arith.constant 0 : i32
    %c0_i32_0 = arith.constant 0 : i32
    %c0_i32_1 = arith.constant 0 : i32
    %c0_i32_2 = arith.constant 0 : i32
    return %c0_i32, %c0_i32_0, %c0_i32_1 : i32, i32, i32
  }
  func.func @transform_8(%arg0: i32) -> (i32, i32, i32) {
    %c0_i32 = arith.constant 0 : i32
    %c0_i32_0 = arith.constant 0 : i32
    %c0_i32_1 = arith.constant 0 : i32
    %c0_i32_2 = arith.constant 0 : i32
    return %c0_i32, %c0_i32_0, %c0_i32_1 : i32, i32, i32
  }
  func.func @transform_9(%arg0: i32) -> (i32, i32, i32) {
    %c0_i32 = arith.constant 0 : i32
    %c0_i32_0 = arith.constant 0 : i32
    %c0_i32_1 = arith.constant 0 : i32
    %c0_i32_2 = arith.constant 0 : i32
    return %c0_i32, %c0_i32_0, %c0_i32_1 : i32, i32, i32
  }
  func.func @transform_10(%arg0: i32) -> (i32, i32) {
    %c0_i32 = arith.constant 0 : i32
    %c0_i32_0 = arith.constant 0 : i32
    %c0_i32_1 = arith.constant 0 : i32
    return %c0_i32, %c0_i32_0 : i32, i32
  }
  func.func @transform_11(%arg0: i32) -> (i32, i32, i32) {
    %c0_i32 = arith.constant 0 : i32
    %c0_i32_0 = arith.constant 0 : i32
    %c0_i32_1 = arith.constant 0 : i32
    return %arg0, %c0_i32, %c0_i32_0 : i32, i32, i32
  }
}

module attributes {stable_mosaic.version = 11 : i64} {
  func.func @vit_block_kernel(%arg0: i32, %arg1: memref<1x8x128xf32, #tpu.memory_space<vmem>>, %arg2: memref<1x128xf32, #tpu.memory_space<vmem>>, %arg3: memref<1x128xf32, #tpu.memory_space<vmem>>, %arg4: memref<1x128x384xbf16, #tpu.memory_space<vmem>>, %arg5: memref<1x1x384xf32, #tpu.memory_space<vmem>>, %arg6: memref<1x128xf32, #tpu.memory_space<vmem>>, %arg7: memref<1x128xf32, #tpu.memory_space<vmem>>, %arg8: memref<1x128x512xbf16, #tpu.memory_space<vmem>>, %arg9: memref<1x1x512xf32, #tpu.memory_space<vmem>>, %arg10: memref<1x512x128xbf16, #tpu.memory_space<vmem>>, %arg11: memref<1x128xf32, #tpu.memory_space<vmem>>, %arg12: memref<1x8x128xf32, #tpu.memory_space<vmem>>, %arg13: memref<8x128xf32, #tpu.memory_space<vmem>>) attributes {dimension_semantics = [#tpu.dimension_semantics<parallel>], iteration_bounds = array<i64: 2>, scalar_prefetch = 0 : i64, scratch_operands = 1 : i64, tpu.core_type = #tpu.core_type<tc>, window_params = [{transform_indices = @transform_0, window_bounds = array<i64: 1, 8, 128>}, {pipeline_mode = #tpu.pipeline_mode<synchronous>, transform_indices = @transform_1, window_bounds = array<i64: 1, 128>}, {pipeline_mode = #tpu.pipeline_mode<synchronous>, transform_indices = @transform_2, window_bounds = array<i64: 1, 128>}, {pipeline_mode = #tpu.pipeline_mode<synchronous>, transform_indices = @transform_3, window_bounds = array<i64: 1, 128, 384>}, {pipeline_mode = #tpu.pipeline_mode<synchronous>, transform_indices = @transform_4, window_bounds = array<i64: 1, 1, 384>}, {pipeline_mode = #tpu.pipeline_mode<synchronous>, transform_indices = @transform_5, window_bounds = array<i64: 1, 128>}, {pipeline_mode = #tpu.pipeline_mode<synchronous>, transform_indices = @transform_6, window_bounds = array<i64: 1, 128>}, {pipeline_mode = #tpu.pipeline_mode<synchronous>, transform_indices = @transform_7, window_bounds = array<i64: 1, 128, 512>}, {pipeline_mode = #tpu.pipeline_mode<synchronous>, transform_indices = @transform_8, window_bounds = array<i64: 1, 1, 512>}, {pipeline_mode = #tpu.pipeline_mode<synchronous>, transform_indices = @transform_9, window_bounds = array<i64: 1, 512, 128>}, {pipeline_mode = #tpu.pipeline_mode<synchronous>, transform_indices = @transform_10, window_bounds = array<i64: 1, 128>}, {transform_indices = @transform_11, window_bounds = array<i64: 1, 8, 128>}]} {
    %c0 = arith.constant 0 : index
    %c0_0 = arith.constant 0 : index
    %c0_1 = arith.constant 0 : index
    %0 = vector.load %arg1[%c0, %c0_0, %c0_1] : memref<1x8x128xf32, #tpu.memory_space<vmem>>, vector<1x8x128xf32>
    %1 = vector.shape_cast %0 : vector<1x8x128xf32> to vector<8x128xf32>
    %c0_2 = arith.constant 0 : index
    %c0_3 = arith.constant 0 : index
    %2 = vector.load %arg2[%c0_2, %c0_3] : memref<1x128xf32, #tpu.memory_space<vmem>>, vector<1x128xf32>
    %c0_4 = arith.constant 0 : index
    %c0_5 = arith.constant 0 : index
    %3 = vector.load %arg3[%c0_4, %c0_5] : memref<1x128xf32, #tpu.memory_space<vmem>>, vector<1x128xf32>
    %cst = arith.constant dense<0.000000e+00> : vector<8xf32>
    %4 = vector.multi_reduction <add>, %1, %cst [1] : vector<8x128xf32> to vector<8xf32>
    %5 = vector.shape_cast %4 : vector<8xf32> to vector<8x1xf32>
    %cst_6 = arith.constant 1.280000e+02 : f32
    %6 = vector.broadcast %cst_6 : f32 to vector<8x1xf32>
    %7 = arith.divf %5, %6 : vector<8x1xf32>
    %8 = vector.broadcast %7 : vector<8x1xf32> to vector<8x128xf32>
    %9 = arith.subf %1, %8 : vector<8x128xf32>
    %10 = arith.mulf %9, %9 : vector<8x128xf32>
    %cst_7 = arith.constant dense<0.000000e+00> : vector<8xf32>
    %11 = vector.multi_reduction <add>, %10, %cst_7 [1] : vector<8x128xf32> to vector<8xf32>
    %12 = vector.shape_cast %11 : vector<8xf32> to vector<8x1xf32>
    %cst_8 = arith.constant 1.280000e+02 : f32
    %13 = vector.broadcast %cst_8 : f32 to vector<8x1xf32>
    %14 = arith.divf %12, %13 : vector<8x1xf32>
    %15 = vector.broadcast %7 : vector<8x1xf32> to vector<8x128xf32>
    %16 = arith.subf %1, %15 : vector<8x128xf32>
    %cst_9 = arith.constant 9.99999974E-6 : f32
    %17 = vector.broadcast %cst_9 : f32 to vector<8x1xf32>
    %18 = arith.addf %14, %17 : vector<8x1xf32>
    %19 = math.rsqrt %18 : vector<8x1xf32>
    %20 = vector.broadcast %19 : vector<8x1xf32> to vector<8x128xf32>
    %21 = arith.mulf %16, %20 : vector<8x128xf32>
    %22 = vector.broadcast %2 : vector<1x128xf32> to vector<8x128xf32>
    %23 = arith.mulf %21, %22 : vector<8x128xf32>
    %24 = vector.broadcast %3 : vector<1x128xf32> to vector<8x128xf32>
    %25 = arith.addf %23, %24 : vector<8x128xf32>
    %26 = arith.truncf %25 : vector<8x128xf32> to vector<8x128xbf16>
    %c0_10 = arith.constant 0 : index
    %c0_11 = arith.constant 0 : index
    %c0_12 = arith.constant 0 : index
    %27 = vector.load %arg4[%c0_10, %c0_11, %c0_12] : memref<1x128x384xbf16, #tpu.memory_space<vmem>>, vector<1x128x384xbf16>
    %28 = vector.shape_cast %27 : vector<1x128x384xbf16> to vector<128x384xbf16>
    %cst_13 = arith.constant dense<0.000000e+00> : vector<8x384xf32>
    %29 = tpu.matmul %26, %28, %cst_13 {dimension_numbers = #tpu.dot_dimension_numbers<[1], [0], [0], [1], [0, 0, 1, 1], [], []>} : vector<8x128xbf16>, vector<128x384xbf16>, vector<8x384xf32> -> vector<8x384xf32>
    %c0_14 = arith.constant 0 : index
    %c0_15 = arith.constant 0 : index
    %c0_16 = arith.constant 0 : index
    %30 = vector.load %arg5[%c0_14, %c0_15, %c0_16] : memref<1x1x384xf32, #tpu.memory_space<vmem>>, vector<1x1x384xf32>
    %31 = vector.shape_cast %30 : vector<1x1x384xf32> to vector<1x384xf32>
    %32 = vector.broadcast %31 : vector<1x384xf32> to vector<8x384xf32>
    %33 = arith.addf %29, %32 : vector<8x384xf32>
    %34 = vector.extract_strided_slice %33 {offsets = [0, 0], sizes = [8, 128], strides = [1, 1]} : vector<8x384xf32> to vector<8x128xf32>
    %35 = arith.truncf %34 : vector<8x128xf32> to vector<8x128xbf16>
    %36 = vector.extract_strided_slice %33 {offsets = [0, 128], sizes = [8, 128], strides = [1, 1]} : vector<8x384xf32> to vector<8x128xf32>
    %37 = arith.truncf %36 : vector<8x128xf32> to vector<8x128xbf16>
    %38 = vector.extract_strided_slice %33 {offsets = [0, 256], sizes = [8, 128], strides = [1, 1]} : vector<8x384xf32> to vector<8x128xf32>
    %39 = arith.truncf %38 : vector<8x128xf32> to vector<8x128xbf16>
    %40 = vector.extract_strided_slice %35 {offsets = [0, 0], sizes = [8, 64], strides = [1, 1]} : vector<8x128xbf16> to vector<8x64xbf16>
    %41 = vector.extract_strided_slice %37 {offsets = [0, 0], sizes = [8, 64], strides = [1, 1]} : vector<8x128xbf16> to vector<8x64xbf16>
    %42 = vector.extract_strided_slice %39 {offsets = [0, 0], sizes = [8, 64], strides = [1, 1]} : vector<8x128xbf16> to vector<8x64xbf16>
    %cst_17 = arith.constant dense<0.000000e+00> : vector<8x8xf32>
    %43 = tpu.matmul %40, %41, %cst_17 {dimension_numbers = #tpu.dot_dimension_numbers<[1], [1], [0], [0], [0, 0, 1, 0], [], []>} : vector<8x64xbf16>, vector<8x64xbf16>, vector<8x8xf32> -> vector<8x8xf32>
    %cst_18 = arith.constant dense<0xFF800000> : vector<8xf32>
    %44 = vector.multi_reduction <maximumf>, %43, %cst_18 [1] : vector<8x8xf32> to vector<8xf32>
    %45 = vector.shape_cast %44 : vector<8xf32> to vector<8x1xf32>
    %46 = vector.broadcast %45 : vector<8x1xf32> to vector<8x8xf32>
    %47 = arith.subf %43, %46 : vector<8x8xf32>
    %48 = math.exp %47 : vector<8x8xf32>
    %cst_19 = arith.constant dense<0.000000e+00> : vector<8xf32>
    %49 = vector.multi_reduction <add>, %48, %cst_19 [1] : vector<8x8xf32> to vector<8xf32>
    %50 = vector.shape_cast %49 : vector<8xf32> to vector<8x1xf32>
    %51 = tpu.reciprocal %50 {approx = true} : vector<8x1xf32> -> vector<8x1xf32>
    %52 = vector.broadcast %51 : vector<8x1xf32> to vector<8x8xf32>
    %53 = arith.mulf %48, %52 : vector<8x8xf32>
    %54 = arith.truncf %53 : vector<8x8xf32> to vector<8x8xbf16>
    %cst_20 = arith.constant dense<0.000000e+00> : vector<8x64xf32>
    %55 = tpu.matmul %54, %42, %cst_20 {dimension_numbers = #tpu.dot_dimension_numbers<[1], [0], [0], [1], [0, 0, 1, 1], [], []>} : vector<8x8xbf16>, vector<8x64xbf16>, vector<8x64xf32> -> vector<8x64xf32>
    %56 = vector.extract_strided_slice %35 {offsets = [0, 64], sizes = [8, 64], strides = [1, 1]} : vector<8x128xbf16> to vector<8x64xbf16>
    %57 = vector.extract_strided_slice %37 {offsets = [0, 64], sizes = [8, 64], strides = [1, 1]} : vector<8x128xbf16> to vector<8x64xbf16>
    %58 = vector.extract_strided_slice %39 {offsets = [0, 64], sizes = [8, 64], strides = [1, 1]} : vector<8x128xbf16> to vector<8x64xbf16>
    %cst_21 = arith.constant dense<0.000000e+00> : vector<8x8xf32>
    %59 = tpu.matmul %56, %57, %cst_21 {dimension_numbers = #tpu.dot_dimension_numbers<[1], [1], [0], [0], [0, 0, 1, 0], [], []>} : vector<8x64xbf16>, vector<8x64xbf16>, vector<8x8xf32> -> vector<8x8xf32>
    %cst_22 = arith.constant dense<0xFF800000> : vector<8xf32>
    %60 = vector.multi_reduction <maximumf>, %59, %cst_22 [1] : vector<8x8xf32> to vector<8xf32>
    %61 = vector.shape_cast %60 : vector<8xf32> to vector<8x1xf32>
    %62 = vector.broadcast %61 : vector<8x1xf32> to vector<8x8xf32>
    %63 = arith.subf %59, %62 : vector<8x8xf32>
    %64 = math.exp %63 : vector<8x8xf32>
    %cst_23 = arith.constant dense<0.000000e+00> : vector<8xf32>
    %65 = vector.multi_reduction <add>, %64, %cst_23 [1] : vector<8x8xf32> to vector<8xf32>
    %66 = vector.shape_cast %65 : vector<8xf32> to vector<8x1xf32>
    %67 = tpu.reciprocal %66 {approx = true} : vector<8x1xf32> -> vector<8x1xf32>
    %68 = vector.broadcast %67 : vector<8x1xf32> to vector<8x8xf32>
    %69 = arith.mulf %64, %68 : vector<8x8xf32>
    %70 = arith.truncf %69 : vector<8x8xf32> to vector<8x8xbf16>
    %cst_24 = arith.constant dense<0.000000e+00> : vector<8x64xf32>
    %71 = tpu.matmul %70, %58, %cst_24 {dimension_numbers = #tpu.dot_dimension_numbers<[1], [0], [0], [1], [0, 0, 1, 1], [], []>} : vector<8x8xbf16>, vector<8x64xbf16>, vector<8x64xf32> -> vector<8x64xf32>
    %72 = tpu.concatenate %55, %71 in 1 : vector<8x64xf32>, vector<8x64xf32> -> vector<8x128xf32>
    %c0_25 = arith.constant 0 : index
    %c0_26 = arith.constant 0 : index
    %73 = vector.load %arg13[%c0_25, %c0_26] : memref<8x128xf32, #tpu.memory_space<vmem>>, vector<8x128xf32>
    tpu.vector_store %arg13[%c0_25, %c0_26], %72 {strides = array<i32>} : memref<8x128xf32, #tpu.memory_space<vmem>>, vector<8x128xf32>,
    %c0_27 = arith.constant 0 : index
    %c0_28 = arith.constant 0 : index
    %74 = vector.load %arg13[%c0_27, %c0_28] : memref<8x128xf32, #tpu.memory_space<vmem>>, vector<8x128xf32>
    %75 = arith.addf %1, %74 : vector<8x128xf32>
    %c0_29 = arith.constant 0 : index
    %c0_30 = arith.constant 0 : index
    %76 = vector.load %arg6[%c0_29, %c0_30] : memref<1x128xf32, #tpu.memory_space<vmem>>, vector<1x128xf32>
    %c0_31 = arith.constant 0 : index
    %c0_32 = arith.constant 0 : index
    %77 = vector.load %arg7[%c0_31, %c0_32] : memref<1x128xf32, #tpu.memory_space<vmem>>, vector<1x128xf32>
    %cst_33 = arith.constant dense<0.000000e+00> : vector<8xf32>
    %78 = vector.multi_reduction <add>, %75, %cst_33 [1] : vector<8x128xf32> to vector<8xf32>
    %79 = vector.shape_cast %78 : vector<8xf32> to vector<8x1xf32>
    %cst_34 = arith.constant 1.280000e+02 : f32
    %80 = vector.broadcast %cst_34 : f32 to vector<8x1xf32>
    %81 = arith.divf %79, %80 : vector<8x1xf32>
    %82 = vector.broadcast %81 : vector<8x1xf32> to vector<8x128xf32>
    %83 = arith.subf %75, %82 : vector<8x128xf32>
    %84 = arith.mulf %83, %83 : vector<8x128xf32>
    %cst_35 = arith.constant dense<0.000000e+00> : vector<8xf32>
    %85 = vector.multi_reduction <add>, %84, %cst_35 [1] : vector<8x128xf32> to vector<8xf32>
    %86 = vector.shape_cast %85 : vector<8xf32> to vector<8x1xf32>
    %cst_36 = arith.constant 1.280000e+02 : f32
    %87 = vector.broadcast %cst_36 : f32 to vector<8x1xf32>
    %88 = arith.divf %86, %87 : vector<8x1xf32>
    %89 = vector.broadcast %81 : vector<8x1xf32> to vector<8x128xf32>
    %90 = arith.subf %75, %89 : vector<8x128xf32>
    %cst_37 = arith.constant 9.99999974E-6 : f32
    %91 = vector.broadcast %cst_37 : f32 to vector<8x1xf32>
    %92 = arith.addf %88, %91 : vector<8x1xf32>
    %93 = math.rsqrt %92 : vector<8x1xf32>
    %94 = vector.broadcast %93 : vector<8x1xf32> to vector<8x128xf32>
    %95 = arith.mulf %90, %94 : vector<8x128xf32>
    %96 = vector.broadcast %76 : vector<1x128xf32> to vector<8x128xf32>
    %97 = arith.mulf %95, %96 : vector<8x128xf32>
    %98 = vector.broadcast %77 : vector<1x128xf32> to vector<8x128xf32>
    %99 = arith.addf %97, %98 : vector<8x128xf32>
    %100 = arith.truncf %99 : vector<8x128xf32> to vector<8x128xbf16>
    %c0_38 = arith.constant 0 : index
    %c0_39 = arith.constant 0 : index
    %c0_40 = arith.constant 0 : index
    %101 = vector.load %arg8[%c0_38, %c0_39, %c0_40] : memref<1x128x512xbf16, #tpu.memory_space<vmem>>, vector<1x128x512xbf16>
    %102 = vector.shape_cast %101 : vector<1x128x512xbf16> to vector<128x512xbf16>
    %cst_41 = arith.constant dense<0.000000e+00> : vector<8x512xf32>
    %103 = tpu.matmul %100, %102, %cst_41 {dimension_numbers = #tpu.dot_dimension_numbers<[1], [0], [0], [1], [0, 0, 1, 1], [], []>} : vector<8x128xbf16>, vector<128x512xbf16>, vector<8x512xf32> -> vector<8x512xf32>
    %c0_42 = arith.constant 0 : index
    %c0_43 = arith.constant 0 : index
    %c0_44 = arith.constant 0 : index
    %104 = vector.load %arg9[%c0_42, %c0_43, %c0_44] : memref<1x1x512xf32, #tpu.memory_space<vmem>>, vector<1x1x512xf32>
    %105 = vector.shape_cast %104 : vector<1x1x512xf32> to vector<1x512xf32>
    %106 = vector.broadcast %105 : vector<1x512xf32> to vector<8x512xf32>
    %107 = arith.addf %103, %106 : vector<8x512xf32>
    %cst_45 = arith.constant 5.000000e-01 : f32
    %108 = vector.broadcast %cst_45 : f32 to vector<8x512xf32>
    %109 = arith.mulf %108, %107 : vector<8x512xf32>
    %cst_46 = arith.constant 0.707106769 : f32
    %110 = vector.broadcast %cst_46 : f32 to vector<8x512xf32>
    %111 = arith.mulf %107, %110 : vector<8x512xf32>
    %112 = math.erf %111 : vector<8x512xf32>
    %cst_47 = arith.constant 1.000000e+00 : f32
    %113 = vector.broadcast %cst_47 : f32 to vector<8x512xf32>
    %114 = arith.addf %113, %112 : vector<8x512xf32>
    %115 = arith.mulf %109, %114 : vector<8x512xf32>
    %c0_48 = arith.constant 0 : index
    %c0_49 = arith.constant 0 : index
    %116 = vector.load %arg11[%c0_48, %c0_49] : memref<1x128xf32, #tpu.memory_space<vmem>>, vector<1x128xf32>
    %117 = vector.broadcast %116 : vector<1x128xf32> to vector<8x128xf32>
    %118 = arith.addf %75, %117 : vector<8x128xf32>
    %119 = arith.truncf %115 : vector<8x512xf32> to vector<8x512xbf16>
    %c0_50 = arith.constant 0 : index
    %c0_51 = arith.constant 0 : index
    %c0_52 = arith.constant 0 : index
    %120 = vector.load %arg10[%c0_50, %c0_51, %c0_52] : memref<1x512x128xbf16, #tpu.memory_space<vmem>>, vector<1x512x128xbf16>
    %121 = vector.shape_cast %120 : vector<1x512x128xbf16> to vector<512x128xbf16>
    %cst_53 = arith.constant dense<0.000000e+00> : vector<8x128xf32>
    %122 = tpu.matmul %119, %121, %cst_53 {dimension_numbers = #tpu.dot_dimension_numbers<[1], [0], [0], [1], [0, 0, 1, 1], [], []>} : vector<8x512xbf16>, vector<512x128xbf16>, vector<8x128xf32> -> vector<8x128xf32>
    %123 = arith.addf %118, %122 : vector<8x128xf32>
    %c0_54 = arith.constant 0 : index
    %c0_55 = arith.constant 0 : index
    %c0_56 = arith.constant 0 : index
    %124 = vector.load %arg12[%c0_54, %c0_55, %c0_56] : memref<1x8x128xf32, #tpu.memory_space<vmem>>, vector<1x8x128xf32>
    %125 = vector.shape_cast %124 : vector<1x8x128xf32> to vector<8x128xf32>
    %126 = vector.shape_cast %123 : vector<8x128xf32> to vector<1x8x128xf32>
    tpu.vector_store %arg12[%c0_54, %c0_55, %c0_56], %126 {strides = array<i32>} : memref<1x8x128xf32, #tpu.memory_space<vmem>>, vector<1x8x128xf32>,
    return
  }
  func.func @transform_0(%arg0: i32) -> (i32, i32, i32) {
    %c0_i32 = arith.constant 0 : i32
    %c0_i32_0 = arith.constant 0 : i32
    %c0_i32_1 = arith.constant 0 : i32
    return %arg0, %c0_i32, %c0_i32_0 : i32, i32, i32
  }
  func.func @transform_1(%arg0: i32) -> (i32, i32) {
    %c0_i32 = arith.constant 0 : i32
    %c0_i32_0 = arith.constant 0 : i32
    %c0_i32_1 = arith.constant 0 : i32
    return %c0_i32, %c0_i32_0 : i32, i32
  }
  func.func @transform_2(%arg0: i32) -> (i32, i32) {
    %c0_i32 = arith.constant 0 : i32
    %c0_i32_0 = arith.constant 0 : i32
    %c0_i32_1 = arith.constant 0 : i32
    return %c0_i32, %c0_i32_0 : i32, i32
  }
  func.func @transform_3(%arg0: i32) -> (i32, i32, i32) {
    %c0_i32 = arith.constant 0 : i32
    %c0_i32_0 = arith.constant 0 : i32
    %c0_i32_1 = arith.constant 0 : i32
    %c0_i32_2 = arith.constant 0 : i32
    return %c0_i32, %c0_i32_0, %c0_i32_1 : i32, i32, i32
  }
  func.func @transform_4(%arg0: i32) -> (i32, i32, i32) {
    %c0_i32 = arith.constant 0 : i32
    %c0_i32_0 = arith.constant 0 : i32
    %c0_i32_1 = arith.constant 0 : i32
    %c0_i32_2 = arith.constant 0 : i32
    return %c0_i32, %c0_i32_0, %c0_i32_1 : i32, i32, i32
  }
  func.func @transform_5(%arg0: i32) -> (i32, i32) {
    %c0_i32 = arith.constant 0 : i32
    %c0_i32_0 = arith.constant 0 : i32
    %c0_i32_1 = arith.constant 0 : i32
    return %c0_i32, %c0_i32_0 : i32, i32
  }
  func.func @transform_6(%arg0: i32) -> (i32, i32) {
    %c0_i32 = arith.constant 0 : i32
    %c0_i32_0 = arith.constant 0 : i32
    %c0_i32_1 = arith.constant 0 : i32
    return %c0_i32, %c0_i32_0 : i32, i32
  }
  func.func @transform_7(%arg0: i32) -> (i32, i32, i32) {
    %c0_i32 = arith.constant 0 : i32
    %c0_i32_0 = arith.constant 0 : i32
    %c0_i32_1 = arith.constant 0 : i32
    %c0_i32_2 = arith.constant 0 : i32
    return %c0_i32, %c0_i32_0, %c0_i32_1 : i32, i32, i32
  }
  func.func @transform_8(%arg0: i32) -> (i32, i32, i32) {
    %c0_i32 = arith.constant 0 : i32
    %c0_i32_0 = arith.constant 0 : i32
    %c0_i32_1 = arith.constant 0 : i32
    %c0_i32_2 = arith.constant 0 : i32
    return %c0_i32, %c0_i32_0, %c0_i32_1 : i32, i32, i32
  }
  func.func @transform_9(%arg0: i32) -> (i32, i32, i32) {
    %c0_i32 = arith.constant 0 : i32
    %c0_i32_0 = arith.constant 0 : i32
    %c0_i32_1 = arith.constant 0 : i32
    %c0_i32_2 = arith.constant 0 : i32
    return %c0_i32, %c0_i32_0, %c0_i32_1 : i32, i32, i32
  }
  func.func @transform_10(%arg0: i32) -> (i32, i32) {
    %c0_i32 = arith.constant 0 : i32
    %c0_i32_0 = arith.constant 0 : i32
    %c0_i32_1 = arith.constant 0 : i32
    return %c0_i32, %c0_i32_0 : i32, i32
  }
  func.func @transform_11(%arg0: i32) -> (i32, i32, i32) {
    %c0_i32 = arith.constant 0 : i32
    %c0_i32_0 = arith.constant 0 : i32
    %c0_i32_1 = arith.constant 0 : i32
    return %arg0, %c0_i32, %c0_i32_0 : i32, i32, i32
  }
}

</mosaic_0001>

<bundles_post_ra>
// kernel: tpu_custom_call.1
= control target key start
LH: loop header
LB: loop body
LE: loop exit
PB: predicated region body
PF: predicated region fallthrough
CT: control target
= control target key end

     0   :  { %s2891_s0 = inlined_call_operand.hbm [shape: f32[2,8,128], index: 0, kind: input, shape index: {}]   ;;  %s2892_s1 = inlined_call_operand.hbm [shape: f32[1,128], index: 1, kind: input, shape index: {}]   ;;  %s2893_s2 = inlined_call_operand.hbm [shape: f32[1,128], index: 2, kind: input, shape index: {}]   ;;  %s2894_s3 = inlined_call_operand.hbm [shape: bf16[1,128,384], index: 3, kind: input, shape index: {}]   ;;  %s2895_s4 = inlined_call_operand.vmem [shape: f32[1,1,384], index: 4, kind: input, shape index: {}]   ;;  %s2896_s5 = inlined_call_operand.vmem [shape: f32[1,128], index: 5, kind: input, shape index: {}]   ;;  %s2897_s6 = inlined_call_operand.vmem [shape: f32[1,128], index: 6, kind: input, shape index: {}]   ;;  %s2898_s7 = inlined_call_operand.hbm [shape: bf16[1,128,512], index: 7, kind: input, shape index: {}]   ;;  %s2899_s8 = inlined_call_operand.vmem [shape: f32[1,1,512], index: 8, kind: input, shape index: {}]   ;;  %s2900_s9 = inlined_call_operand.hbm [shape: bf16[1,512,128], index: 9, kind: input, shape index: {}]   ;;  %s2901_s10 = inlined_call_operand.vmem [shape: f32[1,128], index: 10, kind: input, shape index: {}]   ;;  %s2902_s11 = inlined_call_operand.hbm [shape: f32[2,8,128], index: 11, kind: output, shape index: {}]  }
   0x1   :  { %2907 = sst [smem:[#allocation21_spill]] %s2892_s1 }
   0x2   :  { %2908 = sst [smem:[#allocation22_spill]] %s2893_s2 }
   0x3   :  { %2909 = sst [smem:[#allocation23_spill]] %s2894_s3 }
   0x4   :  { %2910 = sst [smem:[#allocation24_spill]] %s2898_s7 }
   0x5   :  { %2911 = sst [smem:[#allocation25_spill]] %s2900_s9 }
   0x6   :  { %16 = vsyncpa [#allocation4], 0 }
   0x7   :  { %18 = vsyncpa [#allocation4 + $0x1], 0 }
   0x8   :  { %19 = vsyncpa [#allocation7], 0 }
   0x9   :  { %20 = vsyncpa [#allocation10], 0 }
   0xa   :  { %21 = vsyncpa [#allocation13], 0 }
   0xb   :  { %22 = vsyncpa [#allocation5], 0 }
   0xc   :  { %24 = vsyncpa [#allocation5 + $0x1], 0  ;;  %s2593_s17 = smov 0   ;;  %s2595_s18 = smov 0  }
   0xd   :  { %s2597_s19 = smov 0   ;;  %s2599_s20 = smov 0  }
   0xe LB: > { %s2516_s21 = smov [#allocation6]   ;;  %s2614_s23 = sadd.s32 4294967295, %s2514_s20   ;;  %s2514_s20 = sphi %s2599_s20, %s2940_s20   ;;  %s2510_s19 = sphi %s2597_s19, %s2939_s19   ;;  %s2506_s18 = sphi %s2595_s18, %s2938_s18   ;;  %s2502_s17 = sphi %s2593_s17, %s2937_s17  }
   0xf   : > { %s310_s22 = sshll.u32 %s2516_s21, 4  ;;  %p1818_p0 = scmp.ge.s32.totalorder %s2514_s20, 1  ;;  %s311_s22 = int_to_ptr.vmem [resolvable:$true] %s310_s22 }
  0x10   : > { %p2903_p1 = scmp.eq.s32.totalorder %s2614_s23, 0  ;;  %p297_p2 = scmp.lt.s32.totalorder %s2514_s20, 3 }
  0x11   : > { %s2517_s25 = smov [#allocation9]   ;;  %s2518_s28 = smov [#allocation8]  }
  0x12   : > { %p2619_p3 = pnand %p1818_p0, %p297_p2  ;;  %s331_s26 = sshll.u32 %s2517_s25, 4  ;;  %s2626_s26 = int_to_ptr.vmem [resolvable:$true] %s331_s26 }
  0x13   : > { %s321_s29 = sshll.u32 %s2518_s28, 4  ;;  %s2291_s12 = scalar_lea.vmem %s311_s22, 16  ;;  %s2634_s29 = int_to_ptr.vmem [resolvable:$true] %s321_s29 }
  0x14   : > { %s2912_s24 = scalar_select %p2619_p3, 1, 0 }
  0x15   : > { %p2065_p5 = pneg %p2619_p3  ;;  %p2292_p8 = scmp.ne.s32.totalorder %s311_s22, %s2291_s12 }
  0x16   : > { %s2298_s13 = scalar_lea.vmem %s311_s22, 32  ;;  %p2299_p11 = scmp.lt.s32.totalorder %s311_s22, %s311_s22 }
  0x17   : > { %p2630_p6 = pnand %p2065_p5, %p2903_p1  ;;  %p2300_p12 = scmp.lt.s32.totalorder %s2298_s13, %s2291_s12 }
  0x19   : > { %p2638_p7 = pneg %p2630_p6  ;;  %p2301_p13 = por %p2300_p12, %p2299_p11 }
  0x1b   : > { %p2294_p9 = pnand %p2292_p8, %p2638_p7 }
  0x1d   : > { %p2295_p10 = pneg %p2294_p9 }
  0x1f   : > { %p2302_p0 = pnand %p2301_p13, %p2295_p10 }
  0x21   : > { %2305 = shalt.err (!%p2302_p0)
}
  0x22   : > { %s2915_s1 = sld [smem:[#allocation21_spill]]  ;;  %s2317_s16 = scalar_lea.vmem %s2626_s26, 3072 }
  0x23   : > { %p2318_p2 = scmp.ne.s32.totalorder %s2626_s26, %s2317_s16  ;;  %p2325_p9 = scmp.lt.s32.totalorder %s2626_s26, %s2626_s26 }
  0x24   : > { %p2326_p11 = scmp.lt.s32.totalorder %s2317_s16, %s2317_s16 }
  0x25   : > { %p2320_p5 = pnand %p2318_p2, %p2638_p7 }
  0x26   : > { %p2327_p10 = por %p2326_p11, %p2325_p9 }
  0x27   : > { %p2321_p8 = pneg %p2320_p5 }
  0x28   : > { %2068 = dma.hbm_to_vmem [thread:$0]  (!%p2630_p6), %s2915_s1, 16, %s311_s22, [#allocation7]  }
  0x29   : > { %p2328_p12 = pnand %p2327_p10, %p2321_p8 }
  0x2b   : > { %2331 = shalt.err (!%p2328_p12)
}
  0x2c   : > { %s2519_s21 = smov 192   ;;  %s2520_s22 = smov 12  }
  0x2d   : > { %s2916_s3 = sld [smem:[#allocation23_spill]]  ;;  %s2343_s12 = scalar_lea.vmem %s2634_s29, 16 }
  0x2e   : > { %p2344_p13 = scmp.ne.s32.totalorder %s2634_s29, %s2343_s12  ;;  %s2350_s13 = scalar_lea.vmem %s2634_s29, 32 }
  0x2f   : > { %p2351_p5 = scmp.lt.s32.totalorder %s2634_s29, %s2634_s29  ;;  %p2352_p8 = scmp.lt.s32.totalorder %s2350_s13, %s2343_s12 }
  0x30   : > { %p2346_p0 = pnand %p2344_p13, %p2638_p7 }
  0x31   : > { %p2353_p9 = por %p2352_p8, %p2351_p5 }
  0x32   : > { %p2347_p2 = pneg %p2346_p0 }
  0x33   : > { %2074 = dma.hbm_to_vmem [thread:$0]  (!%p2630_p6), %s2916_s3, 3072, %s2626_s26, [#allocation10], %s2519_s21, %s2519_s21, %s2520_s22  }
  0x34   : > { %p2354_p11 = pnand %p2353_p9, %p2347_p2 }
  0x36   : > { %2357 = shalt.err (!%p2354_p11)
}
  0x37   : > { %s2917_s2 = sld [smem:[#allocation22_spill]]  ;;  %s2521_s26 = smov [#allocation11]  }
  0x38   : > { %s353_s16 = sshll.u32 %s2521_s26, 4  ;;  %s354_s16 = int_to_ptr.vmem [resolvable:$true] %s353_s16 }
  0x39   : > { %s2369_s21 = scalar_lea.vmem %s354_s16, 4096  ;;  %p2377_p0 = scmp.lt.s32.totalorder %s354_s16, %s354_s16 }
  0x3a   : > { %p2370_p10 = scmp.ne.s32.totalorder %s354_s16, %s2369_s21  ;;  %p2378_p5 = scmp.lt.s32.totalorder %s2369_s21, %s2369_s21 }
  0x3c   : > { %p2372_p12 = pnand %p2370_p10, %p2638_p7  ;;  %p2379_p2 = por %p2378_p5, %p2377_p0 }
  0x3d   : > { %2071 = dma.hbm_to_vmem [thread:$0]  (!%p2630_p6), %s2917_s2, 16, %s2634_s29, [#allocation7]  }
  0x3e   : > { %p2373_p13 = pneg %p2372_p12 }
  0x40   : > { %p2380_p8 = pnand %p2379_p2, %p2373_p13 }
  0x42   : > { %2383 = shalt.err (!%p2380_p8)
}
  0x43   : > { %s2522_s22 = smov 256   ;;  %s2523_s25 = smov 16  }
  0x44   : > { %s2918_s7 = sld [smem:[#allocation24_spill]]  ;;  %s2524_s12 = smov [#allocation12]  }
  0x45   : > { %s369_s13 = sshll.u32 %s2524_s12, 4  ;;  %s370_s13 = int_to_ptr.vmem [resolvable:$true] %s369_s13 }
  0x46   : > { %s2395_s14 = scalar_lea.vmem %s370_s13, 4096  ;;  %p2403_p12 = scmp.lt.s32.totalorder %s370_s13, %s370_s13 }
  0x47   : > { %p2396_p9 = scmp.ne.s32.totalorder %s370_s13, %s2395_s14  ;;  %p2404_p13 = scmp.lt.s32.totalorder %s2395_s14, %s2395_s14 }
  0x49   : > { %p2398_p11 = pnand %p2396_p9, %p2638_p7  ;;  %p2405_p0 = por %p2404_p13, %p2403_p12 }
  0x4a   : > { %2077 = dma.hbm_to_vmem [thread:$0]  (!%p2630_p6), %s2918_s7, 4096, %s354_s16, [#allocation10], %s2522_s22, %s2522_s22, %s2523_s25  }
  0x4b   : > { %p2399_p10 = pneg %p2398_p11 }
  0x4d   : > { %p2406_p5 = pnand %p2405_p0, %p2399_p10 }
  0x4f   : > { %2409 = shalt.err (!%p2406_p5)
}
  0x50   : > { %s2525_s15 = smov 64   ;;  %s2526_s30 = smov 4  }
  0x51   : > { %s2919_s9 = sld [smem:[#allocation25_spill]]  ;;  %s1817_s21 = sadd.s32 4294967294, %s2514_s20  }
  0x52   : > { %s2690_s22 = sadd.s32 1, %s2514_s20   ;;  %s37_s25 = sadd.s32 1, %s2510_s19 }
  0x53   : > { %s34_s28 = ssub.s32 %s2514_s20, %s2690_s22  ;;  %p44_p7 = scmp.ne.s32.totalorder %s2510_s19, %s2506_s18 }
  0x54   : > { %p35_p2 = scmp.eq.s32.totalorder %s34_s28, 0  ;;  %p45_p8 = scmp.eq.s32.totalorder %s2514_s20, 0 }
  0x55   : > { %p50_p9 = scmp.ne.s32.totalorder %s2506_s18, %s2502_s17  ;;  %p284_p11 = scmp.eq.s32.totalorder %s2614_s23, 1 }
  0x56   : > { %s2702_s29 = scalar_select %p35_p2, %s2510_s19, %s37_s25  }
  0x57   : > { %2080 = dma.hbm_to_vmem [thread:$0]  (!%p2630_p6), %s2919_s9, 4096, %s370_s13, [#allocation13], %s2525_s15, %s2525_s15, %s2526_s30  }
  0x58   : > { %2920 = sst [smem:[#allocation20_spill]] %s2702_s29  ;;  %p46_p10 = por %p45_p8, %p44_p7 }
  0x59   : > { %p2706_p12 = por %p2903_p1, %p50_p9  ;;  %p2710_p6 = por %p284_p11, %p44_p7 }
  0x5a   : > { %p290_p13 = scmp.eq.s32.totalorder %s1817_s21, 1  ;;  %p2094_p0 = scmp.lt.s32.totalorder %s2514_s20, 2 }
  0x5b   : > { %s2921_s27 = scalar_select %p2706_p12, 1, 0 }
  0x5c   : > { %s2922_s12 = scalar_select %p2710_p6, 1, 0 }
  0x5d   : > { %s386_s13 = sand.u32 1, %s2510_s19   ;;  %p2716_p5 = por %p290_p13, %p50_p9 }
  0x5e   : > { %s1825_s15 = sshll.u32 %s386_s13, 3  ;;  %s1826_s30 = sshll.u32 %s2514_s20, 7 }
  0x5f   : > { %s2923_s14 = scalar_select %p2716_p5, 1, 0 }
  0x60   : > { %s2724_s25 = scalar_lea.hbm %s2891_s0, %s1826_s30  ;;  %s390_s28 = scalar_lea.vmem [#allocation3], %s1825_s15 }
  0x61   : > { %s397_s1 = sshll.u32 %s390_s28, 4  ;;  %p2726_p7 = pnand %p2094_p0, %p46_p10  ;;  %s398_s1 = int_to_ptr.vmem [resolvable:$true] %s397_s1 }
  0x62   : > { %s387_s2 = scalar_lea.sflag [#allocation4], %s386_s13  ;;  %s2410_s3 = scalar_lea.hbm %s2724_s25, 128 }
  0x63   : > { %p2411_p2 = scmp.ne.s32.totalorder %s2724_s25, %s2410_s3  ;;  %p2412_p8 = pneg %p2726_p7 }
  0x64   : > { %s2415_s16 = scalar_lea.hbm %s2891_s0, 256  ;;  %p2416_p10 = scmp.lt.s32.totalorder %s2724_s25, %s2891_s0 }
  0x65   : > { %p2413_p9 = pnand %p2412_p8, %p2411_p2  ;;  %p2417_p13 = scmp.lt.s32.totalorder %s2415_s16, %s2410_s3 }
  0x67   : > { %p2414_p11 = pneg %p2413_p9  ;;  %p2418_p0 = por %p2417_p13, %p2416_p10 }
  0x69   : > { %p2419_p4 = pnand %p2418_p0, %p2414_p11 }
  0x6b   : > { %2422 = shalt.err (!%p2419_p4)
}
  0x6c   : > { %s2423_s28 = scalar_lea.vmem %s398_s1, 128  ;;  %s2527_s13 = smov [#allocation3]  }
  0x6d   : > { %p2424_p1 = scmp.ne.s32.totalorder %s398_s1, %s2423_s28  ;;  %s2428_s9 = sshll.u32 %s2527_s13, 4  ;;  %s2429_s9 = int_to_ptr.vmem [resolvable:$false] %s2428_s9 }
  0x6e   : > { %s2430_s29 = scalar_lea.vmem %s2429_s9, 256  ;;  %p2431_p2 = scmp.lt.s32.totalorder %s398_s1, %s2429_s9 }
  0x6f   : > { %p2426_p5 = pnand %p2424_p1, %p2412_p8  ;;  %p2432_p9 = scmp.lt.s32.totalorder %s2430_s29, %s2423_s28 }
  0x71   : > { %p2427_p6 = pneg %p2426_p5  ;;  %p2433_p12 = por %p2432_p9, %p2431_p2 }
  0x73   : > { %p2434_p3 = pnand %p2433_p12, %p2427_p6 }
  0x75   : > { %2437 = shalt.err (!%p2434_p3)
}
  0x76   : > { %2084 = dma.hbm_to_vmem [thread:$0]  (!%p2726_p7), %s2724_s25, 128, %s398_s1, %s387_s2  }
  0x77   : > { %p2925_p11 = scmp.ne.s32.totalorder %s2912_s24, 0 }
  0x78   : > { %s2747_s3 = sand.u32 (!%p2925_p11), 1, %s2506_s18   ;;  %p2926_p1 = scmp.ne.s32.totalorder (!%p2925_p11), %s2921_s27, 0 }
  0x79   : > { %406 = sbr.rel (%p2925_p11) target bundleno = 2328 (0x918), region = 64  ;;  %s1828_s7 = sshll.u32 (!%p2925_p11), %s2747_s3, 3 }
  0x7a   : > { %s409_s9 = scalar_lea.sflag (!%p2925_p11), [#allocation4], %s2747_s3  ;;  %s412_s29 = scalar_lea.vmem (!%p2925_p11), [#allocation3], %s1828_s7 }
  0x7e   : > { %2481 = dma.done.wait (%p2926_p1), %s409_s9, 128  }
  0x7f   : > { %2483 = vsyncadd (%p2926_p1), %s409_s9, 4294967168  ;;  %p2927_p3 = scmp.eq.s32.totalorder %s2614_s23, 0 }
  0x81   : > { %2485 = dma.done.wait (%p2927_p3), [#allocation7], 32   ;;  %p2928_p4 = pmov %p2927_p3 }
  0x82   : > { %p2929_p12 = pmov %p2927_p3 }
  0x83   : > { %2487 = vsyncadd (%p2928_p4), [#allocation7], 4294967264 }
  0x84   : > { %2489 = dma.done.wait (%p2929_p12), [#allocation10], 7168   ;;  %p2930_p6 = pmov %p2927_p3 }
  0x85   : > { %p2931_p5 = pmov %p2927_p3 }
  0x86   : > { %2491 = vsyncadd (%p2930_p6), [#allocation10], 4294960128 }
  0x87   : > { %2493 = dma.done.wait (%p2931_p5), [#allocation13], 4096   ;;  %p2932_p7 = pmov %p2927_p3 }
  0x88   : > { %v2769_v0 = vld [vmem:[%s412_s29] sm:$0xff]  ;;  %v2528_v3 = vmov 0.0   ;;  %v2156_v12 = vld [vmem:[#allocation9 + $0x7c] ss:$12 sps:$4 sm:$0xff]   ;;  %v2529_v22 = vmov 0   ;;  %vm2530_vm0 = vmmov 0   ;;  %v536_v41 = vlaneseq }
  0x89   : > { %2495 = vsyncadd (%p2932_p7), [#allocation13], 4294963200  ;;  %475 = vadd.xlane.f32.xlu0 %v2769_v0  ;;  %v2148_v1 = vld [vmem:[#allocation9 + $0xac] ss:$12 sps:$4 sm:$0xff]   ;;  %v2150_v2 = vld [vmem:[#allocation9 + $0xa8] ss:$12 sps:$4 sm:$0xff]   ;;  %1997 = vmatprep.subr.bf16.mxu1 %v2528_v3 }
  0x8a   : > { %v2151_v4 = vld [vmem:[#allocation9 + $0xb0] ss:$12 sps:$4 sm:$0xff]   ;;  %v2152_v5 = vld [vmem:[#allocation9 + $0x94] ss:$12 sps:$4 sm:$0xff]   ;;  %679 = vmatprep.subr.bf16.mxu0 %v2148_v1  ;;  %v2155_v7 = vld [vmem:[#allocation9 + $0x98] ss:$12 sps:$4 sm:$0xff]   ;;  %711 = vmatprep.mubr.bf16.mxu0 %v2529_v22 }
  0x8b   : > { %v2154_v6 = vld [vmem:[#allocation9 + $0x90] ss:$12 sps:$4 sm:$0xff]   ;;  %680 = vmatpush1.bf16.msra.mxu0 %v2150_v2  ;;  %1998 = vmatpush3.bf16.msra.mxu1 %v2151_v4  ;;  %v2158_v13 = vld [vmem:[#allocation9 + $0x78] ss:$12 sps:$4 sm:$0xff]   ;;  %v2159_v14 = vld [vmem:[#allocation9 + $0x80] ss:$12 sps:$4 sm:$0xff]  }
  0x8c   : > { %681 = vmatprep.subr.bf16.mxu0 %v2152_v5  ;;  %1999 = vmatprep.subr.bf16.mxu1 %v2528_v3  ;;  %v2160_v15 = vld [vmem:[#allocation9 + $0x64] ss:$12 sps:$4 sm:$0xff]   ;;  %v2162_v16 = vld [vmem:[#allocation9 + $0x60] ss:$12 sps:$4 sm:$0xff]   ;;  %v2163_v17 = vld [vmem:[#allocation9 + $0x68] ss:$12 sps:$4 sm:$0xff]  }
  0x8d   : > { %v2164_v18 = vld [vmem:[#allocation9 + $0x4c] ss:$12 sps:$4 sm:$0xff]   ;;  %v2166_v19 = vld [vmem:[#allocation9 + $0x48] ss:$12 sps:$4 sm:$0xff]   ;;  %v2167_v20 = vld [vmem:[#allocation9 + $0x50] ss:$12 sps:$4 sm:$0xff]   ;;  %2013 = vmatprep.mubr.msk.bf16.mxu1 %vm2530_vm0, %v2528_v3 }
  0x8e   : > { %v2168_v21 = vld [vmem:[#allocation9 + $0x34] ss:$12 sps:$4 sm:$0xff]   ;;  %v2170_v23 = vld [vmem:[#allocation9 + $0x30] ss:$12 sps:$4 sm:$0xff]   ;;  %v2171_v24 = vld [vmem:[#allocation9 + $0x38] ss:$12 sps:$4 sm:$0xff]  }
  0x8f   : > { %682 = vmatpush1.bf16.msra.mxu0 %v2154_v6  ;;  %2000 = vmatpush3.bf16.msra.mxu1 %v2155_v7  ;;  %v2172_v25 = vld [vmem:[#allocation9 + $0x1c] ss:$12 sps:$4 sm:$0xff]   ;;  %v2174_v26 = vld [vmem:[#allocation9 + $0x18] ss:$12 sps:$4 sm:$0xff]   ;;  %v2175_v27 = vld [vmem:[#allocation9 + $0x20] ss:$12 sps:$4 sm:$0xff]  }
  0x90   : > { %2001 = vmatprep.subr.bf16.mxu1 %v2528_v3  ;;  %683 = vmatprep.subr.bf16.mxu0 %v2156_v12  ;;  %v2176_v28 = vld [vmem:[#allocation9 + $0x4] ss:$12 sps:$4 sm:$0xff]   ;;  %v2178_v29 = vld [vmem:[#allocation9] ss:$12 sps:$4 sm:$0xff]   ;;  %v2179_v30 = vld [vmem:[#allocation9 + $0x8] ss:$12 sps:$4 sm:$0xff]  }
  0x91   : > { %v1835_v35 = vld [vmem:[#allocation6] ss:$0 sm:$0xff]  ;;  %v1836_v37 = vld [vmem:[#allocation8] ss:$0 sm:$0xff]  ;;  %v2790_v42 = vshrl.u32 %v536_v41, 7  ;;  %vm826_vm1 = vcmask 1043456  }
  0x92   : > { %v534_v44 = vld [vmem:[%s2895_s4] sm:$0x7]  ;;  %vm763_vm2 = vcmask 523264   ;;  %s2531_s24 = smov 64   ;;  %vm810_vm3 = vcmask 64512   ;;  %s1933_s13 = sshll.u32 %s2614_s23, 7 }
  0x93   : > { %684 = vmatpush1.bf16.msra.mxu0 %v2158_v13  ;;  %2002 = vmatpush3.bf16.msra.mxu1 %v2159_v14  ;;  %v546_v43 = vsub.s32 2, %v2790_v42  ;;  %v542_v45 = vsub.s32 1, %v2790_v42  ;;  %v538_v46 = vsub.s32 0, %v2790_v42  ;;  %s470_s9 = scalar_lea.vmem [#allocation14], %s1828_s7  ;;  %s1686_s27 = scalar_lea.sflag [#allocation5], %s2747_s3 }
  0x94   : > { %2003 = vmatprep.subr.bf16.mxu1 %v2528_v3  ;;  %685 = vmatprep.subr.bf16.mxu0 %v2160_v15  ;;  %s1699_s29 = sshll.u32 %s470_s9, 4  ;;  %p2933_p10 = scmp.ne.s32.totalorder %s2922_s12, 0  ;;  %s1700_s29 = int_to_ptr.vmem [resolvable:$true] %s1699_s29 }
  0x95   : > { %v547_v47 = vrot.slane %v534_v44, %v546_v43  ;;  %v543_v48 = vrot.slane %v534_v44, %v542_v45  ;;  %v539_v51 = vrot.slane %v534_v44, %v538_v46  ;;  %s2438_s25 = scalar_lea.vmem %s1700_s29, 128  ;;  %s2532_s23 = smov [#allocation14]  }
  0x96   : > { %p2439_p8 = scmp.ne.s32.totalorder %s1700_s29, %s2438_s25  ;;  %s2442_s7 = sshll.u32 %s2532_s23, 4  ;;  %s2443_s7 = int_to_ptr.vmem [resolvable:$false] %s2442_s7 }
  0x97   : > { %686 = vmatpush1.bf16.msra.mxu0 %v2162_v16  ;;  %2004 = vmatpush3.bf16.msra.mxu1 %v2163_v17  ;;  %s2444_s21 = scalar_lea.vmem %s2443_s7, 256  ;;  %p2445_p2 = scmp.lt.s32.totalorder %s1700_s29, %s2443_s7 }
  0x98   : > { %687 = vmatprep.subr.bf16.mxu0 %v2164_v18  ;;  %2005 = vmatprep.subr.bf16.mxu1 %v2528_v3  ;;  %p2440_p13 = pnand %p2439_p8, %p2933_p10  ;;  %p2446_p9 = scmp.lt.s32.totalorder %s2444_s21, %s2438_s25 }
  0x9a   : > { %p2441_p0 = pneg %p2440_p13  ;;  %p2447_p11 = por %p2446_p9, %p2445_p2 }
  0x9b   : > { %688 = vmatpush1.bf16.msra.mxu0 %v2166_v19  ;;  %2006 = vmatpush3.bf16.msra.mxu1 %v2167_v20 }
  0x9c   : > { %689 = vmatprep.subr.bf16.mxu0 %v2168_v21  ;;  %2007 = vmatprep.subr.bf16.mxu1 %v2528_v3  ;;  %p2448_p1 = pnand %p2447_p11, %p2441_p0 }
  0x9f   : > { %690 = vmatpush1.bf16.msra.mxu0 %v2170_v23  ;;  %2008 = vmatpush3.bf16.msra.mxu1 %v2171_v24 }
  0xa0   : > { %691 = vmatprep.subr.bf16.mxu0 %v2172_v25  ;;  %2009 = vmatprep.subr.bf16.mxu1 %v2528_v3 }
  0xa3   : > { %692 = vmatpush1.bf16.msra.mxu0 %v2174_v26  ;;  %2010 = vmatpush3.bf16.msra.mxu1 %v2175_v27 }
  0xa4   : > { %693 = vmatprep.subr.bf16.mxu0 %v2176_v28  ;;  %2011 = vmatprep.subr.bf16.mxu1 %v2528_v3 }
  0xa7   : > { %694 = vmatpush1.bf16.msra.mxu0 %v2178_v29  ;;  %2012 = vmatpush3.bf16.msra.mxu1 %v2179_v30 }
  0xa8   : > { %2023 = vmatprep.subr.bf16.mxu1 %v2528_v3  ;;  %2017 = vmatprep.subr.bf16.mxu0 %v2528_v3 }
 0x112   : > { %v476_v8 = vpop.xlane.xlu0 %475 }
 0x113   : > { %v478_v9 = vmul.f32 0.0078125, %v476_v8 }
 0x115   : > { %v479_v10 = vsub.f32 %v2769_v0, %v478_v9 }
 0x117   : > { %v480_v11 = vmul.f32 %v479_v10, %v479_v10 }
 0x119   : > { %481 = vadd.xlane.f32.xlu0 %v480_v11 }
 0x1a2   : > { %v482_v31 = vpop.xlane.xlu0 %481 }
 0x1a3   : > { %v483_v32 = vmul.f32 0.0078125, %v482_v31 }
 0x1a5   : > { %v484_v33 = vadd.f32 1e-05, %v483_v32 }
 0x1a7   : > { %2260 = vrsqrt.f32 %v484_v33 }
 0x1b4   : > { %v2261_v34 = vpop.eup %2260 }
 0x1b5   : > { %v486_v36 = vmul.f32 %v2261_v34, %v479_v10 }
 0x1b7   : > { %v493_v38 = vmul.f32 %v1835_v35, %v486_v36 }
 0x1b9   : > { %v500_v39 = vadd.f32 %v1836_v37, %v493_v38 }
 0x1bb   : > { %v501_v40 = vpack.c.bf16 %v500_v39, %v500_v39 }
 0x1bd   : > { %712 = vmatmul.mubr.bf16.vlgmr.msra.gmra.mxu0 %v501_v40  ;;  %2014 = vmatmul.mubr.bf16.vlgmr.msra.gmra.mxu1 %v501_v40 }
 0x1be   : > { %2019 = vmatprep.mubr.msk.bf16.mxu0 %vm2530_vm0, %v2528_v3  ;;  %2025 = vmatprep.mubr.msk.bf16.mxu1 %vm2530_vm0, %v2528_v3 }
 0x27d   : > { %v713_v49 = vpop.f32.mrf.mxu0  ;;  %v754_v50 = vpop.f32.mrf.mxu1 }
 0x27e   : > { %v755_v52 = vadd.f32 %v754_v50, %v547_v47  ;;  %v714_v59 = vadd.f32 %v713_v49, %v539_v51 }
 0x27f   : > { %v715_v53 = vpop.f32.mrf.mxu0  ;;  %v2015_v54 = vpop.f32.mrf.mxu1 }
 0x280   : > { %v762_v55 = vpack.c.bf16 %v755_v52, %v755_v52  ;;  %v716_v56 = vadd.f32 %v715_v53, %v543_v48  ;;  %v760_v2 = vpack.c.bf16 %v714_v59, %v714_v59  ;;  %v2180_v52 = vld [vmem:[#allocation11 + $0xe0] ss:$16 sps:$4 sm:$0xff]   ;;  %v2183_v53 = vld [vmem:[#allocation11 + $0xe8] ss:$16 sps:$4 sm:$0xff]   ;;  %v2185_v54 = vld [vmem:[#allocation11 + $0xec] ss:$16 sps:$4 sm:$0xff]  }
 0x281   : > { %v717_v57 = vpop.f32.mrf.mxu0  ;;  %v757_v58 = vpop.f32.mrf.mxu1 }
 0x282   : > { %v828_v60 = vsel %vm826_vm1, %v762_v55, 0  ;;  %v761_v61 = vpack.c.bf16 %v716_v56, %v716_v56  ;;  %v2191_v56 = vld [vmem:[#allocation11 + $0xcc] ss:$16 sps:$4 sm:$0xff]   ;;  %v2186_v57 = vld [vmem:[#allocation11 + $0xc0] ss:$16 sps:$4 sm:$0xff]  }
 0x283   : > { %v718_v62 = vpop.f32.mrf.mxu0  ;;  %v2016_v63 = vpop.f32.mrf.mxu1  ;;  %2024 = vmatpush3.bf16.msra.mxu1 %v828_v60  ;;  %v2189_v58 = vld [vmem:[#allocation11 + $0xc8] ss:$16 sps:$4 sm:$0xff]  }
 0x284   : > { %v768_v1 = vsel %vm763_vm2, %v761_v61, 0  ;;  %874 = vrot.lane.b32.xlu1 %v761_v61, %s2531_s24  ;;  %2035 = vmatprep.subr.bf16.mxu1 %v2528_v3  ;;  %v2194_v62 = vld [vmem:[#allocation11 + $0xa4] ss:$16 sps:$4 sm:$0xff]   ;;  %v2197_v63 = vld [vmem:[#allocation11 + $0xac] ss:$16 sps:$4 sm:$0xff]  }
 0x285   : > { %2018 = vmatpush3.bf16.xpose.msra.mxu0 %v768_v1  ;;  %v2192_v1 = vld [vmem:[#allocation11 + $0xa0] ss:$16 sps:$4 sm:$0xff]  }
 0x286   : > { %2029 = vmatprep.subr.bf16.mxu0 %v2528_v3 }
 0x288   : > { %871 = vrot.lane.b32.xlu1 %v760_v2, %s2531_s24 }
 0x28c   : > { %2020 = vmatmul.mubr.msk.bf16.vlgmr.msra.gmra.mxu0 %vm763_vm2, %v760_v2  ;;  %v2195_v2 = vld [vmem:[#allocation11 + $0xa8] ss:$16 sps:$4 sm:$0xff]  }
 0x28d   : > { %2031 = vmatprep.mubr.msk.bf16.mxu0 %vm2530_vm0, %v2528_v3 }
 0x2f6   : > { %v875_v4 = vpop.permute.xlu1 %874 }
 0x2f7   : > { %v880_v5 = vsel %vm763_vm2, %v875_v4, 0  ;;  %v2198_v4 = vld [vmem:[#allocation11 + $0x80] ss:$16 sps:$4 sm:$0xff]  }
 0x2f8   : > { %2030 = vmatpush3.bf16.xpose.msra.mxu0 %v880_v5  ;;  %v2200_v5 = vld [vmem:[#allocation11 + $0x84] ss:$16 sps:$4 sm:$0xff]  }
 0x2fa   : > { %v872_v6 = vpop.permute.xlu1 %871 }
 0x2ff   : > { %2032 = vmatmul.mubr.msk.bf16.vlgmr.msra.gmra.mxu0 %vm763_vm2, %v872_v6  ;;  %v2201_v6 = vld [vmem:[#allocation11 + $0x88] ss:$16 sps:$4 sm:$0xff]  }
 0x300   : > { %1265 = vmatprep.mubr.bf16.mxu0 %v2529_v22 }
 0x34c   : > { %v804_v7 = vpop.f32.mrf.mxu0 }
 0x34d   : > { %v811_v8 = vsel %vm810_vm3, %v804_v7, -inf }
 0x34e   : > { %812 = vmax.xlane.f32.xlu0 %v811_v8  ;;  %v2021_v9 = vpop.f32.mrf.mxu0  ;;  %v2206_v8 = vld [vmem:[#allocation11 + $0x64] ss:$16 sps:$4 sm:$0xff]  }
 0x34f   : > { %v2209_v9 = vld [vmem:[#allocation11 + $0x6c] ss:$16 sps:$4 sm:$0xff]  }
 0x350   : > { %v807_v10 = vpop.f32.mrf.mxu0 }
 0x351   : > { %v2204_v10 = vld [vmem:[#allocation11 + $0x60] ss:$16 sps:$4 sm:$0xff]  }
 0x352   : > { %v2022_v11 = vpop.f32.mrf.mxu0 }
 0x353   : > { %v2207_v11 = vld [vmem:[#allocation11 + $0x68] ss:$16 sps:$4 sm:$0xff]  }
 0x3bf   : > { %v916_v12 = vpop.f32.mrf.mxu0 }
 0x3c0   : > { %v922_v13 = vsel %vm810_vm3, %v916_v12, -inf }
 0x3c1   : > { %923 = vmax.xlane.f32.xlu1 %v922_v13  ;;  %v2033_v14 = vpop.f32.mrf.mxu0  ;;  %v2215_v13 = vld [vmem:[#allocation11 + $0x4c] ss:$16 sps:$4 sm:$0xff]  }
 0x3c2   : > { %v2210_v14 = vld [vmem:[#allocation11 + $0x40] ss:$16 sps:$4 sm:$0xff]  }
 0x3c3   : > { %v919_v15 = vpop.f32.mrf.mxu0 }
 0x3c4   : > { %v2213_v15 = vld [vmem:[#allocation11 + $0x48] ss:$16 sps:$4 sm:$0xff]  }
 0x3c5   : > { %v2034_v16 = vpop.f32.mrf.mxu0 }
 0x3c6   : > { %v2218_v16 = vld [vmem:[#allocation11 + $0x24] ss:$16 sps:$4 sm:$0xff]  }
 0x3d7   : > { %v813_v17 = vpop.xlane.xlu0 %812 }
 0x3d8   : > { %v814_v18 = vsub.f32 %v804_v7, %v813_v17  ;;  %v2203_v7 = vld [vmem:[#allocation11 + $0x8c] ss:$16 sps:$4 sm:$0xff]  }
 0x3d9   : > { %v2221_v17 = vld [vmem:[#allocation11 + $0x2c] ss:$16 sps:$4 sm:$0xff]  }
 0x3da   : > { %v815_v19 = vmul.f32 1.442695, %v814_v18  ;;  %v2216_v18 = vld [vmem:[#allocation11 + $0x20] ss:$16 sps:$4 sm:$0xff]  }
 0x3dc   : > { %2262 = vpow2.f32 %v815_v19  ;;  %v2219_v19 = vld [vmem:[#allocation11 + $0x28] ss:$16 sps:$4 sm:$0xff]  }
 0x3e9   : > { %v2263_v20 = vpop.eup %2262 }
 0x3ea   : > { %v817_v21 = vsel %vm810_vm3, %v2263_v20, 0.0 }
 0x3eb   : > { %818 = vadd.xlane.f32.xlu0 %v817_v21  ;;  %v2227_v21 = vld [vmem:[#allocation11 + $0xc] ss:$16 sps:$4 sm:$0xff]  }
 0x44a   : > { %v924_v23 = vpop.xlane.xlu1 %923 }
 0x44b   : > { %v925_v24 = vsub.f32 %v916_v12, %v924_v23  ;;  %v2212_v12 = vld [vmem:[#allocation11 + $0x44] ss:$16 sps:$4 sm:$0xff]   ;;  %v2222_v23 = vld [vmem:[#allocation11] ss:$16 sps:$4 sm:$0xff]  }
 0x44d   : > { %v926_v25 = vmul.f32 1.442695, %v925_v24  ;;  %v2225_v24 = vld [vmem:[#allocation11 + $0x8] ss:$16 sps:$4 sm:$0xff]  }
 0x44f   : > { %2264 = vpow2.f32 %v926_v25  ;;  %v2228_v25 = vld [vmem:[#allocation12 + $0x78] sm:$0xff]  }
 0x45c   : > { %v2265_v26 = vpop.eup %2264 }
 0x45d   : > { %v928_v27 = vsel %vm810_vm3, %v2265_v26, 0.0 }
 0x45e   : > { %929 = vadd.xlane.f32.xlu0 %v928_v27 }
 0x474   : > { %v819_v28 = vpop.xlane.xlu0 %818  ;;  %935 = vrot.lane.b32.xlu0 %v762_v55, %s2531_s24  ;;  %v2188_v55 = vld [vmem:[#allocation11 + $0xc4] ss:$16 sps:$4 sm:$0xff]  }
 0x475   : > { %2266 = vrcp.f32 %v819_v28 }
 0x482   : > { %v2267_v29 = vpop.eup %2266 }
 0x483   : > { %v821_v30 = vmul.f32 %v2267_v29, %v2263_v20  ;;  %v2224_v20 = vld [vmem:[#allocation11 + $0x4] ss:$16 sps:$4 sm:$0xff]  }
 0x485   : > { %v822_v31 = vpack.c.bf16 %v821_v30, %v821_v30 }
 0x487   : > { %2026 = vmatmul.mubr.msk.bf16.vlgmr.msra.gmra.mxu1 %vm810_vm3, %v822_v31  ;;  %v1865_v31 = vld [vmem:[%s2896_s5] ss:$0 sm:$0xff] }
 0x488   : > { %2037 = vmatprep.mubr.msk.bf16.mxu1 %vm2530_vm0, %v2528_v3 }
 0x4e7   : > { %v930_v32 = vpop.xlane.xlu0 %929 }
 0x4e8   : > { %2268 = vrcp.f32 %v930_v32 }
 0x4eb   : > { %v936_v33 = vpop.permute.xlu0 %935 }
 0x4ec   : > { %v941_v34 = vsel %vm826_vm1, %v936_v33, 0  ;;  %v1866_v33 = vld [vmem:[%s2897_s6] ss:$0 sm:$0xff] }
 0x4ed   : > { %2036 = vmatpush3.bf16.msra.mxu1 %v941_v34 }
 0x4ee   : > { %1274 = vmatprep.subr.bf16.mxu1 %v2185_v54  ;;  %v2244_v54 = vld [vmem:[#allocation12 + $0x58] sm:$0xff]  }
 0x4f5   : > { %v2269_v35 = vpop.eup %2268 }
 0x4f6   : > { %v932_v36 = vmul.f32 %v2269_v35, %v2265_v26  ;;  %v2229_v26 = vld [vmem:[#allocation12 + $0xf8] sm:$0xff]  }
 0x4f8   : > { %v933_v37 = vpack.c.bf16 %v932_v36, %v932_v36  ;;  %v2230_v36 = vld [vmem:[#allocation12 + $0x38] sm:$0xff]  }
 0x4fa   : > { %2038 = vmatmul.mubr.msk.bf16.vlgmr.msra.gmra.mxu1 %vm810_vm3, %v933_v37  ;;  %v2231_v37 = vld [vmem:[#allocation12 + $0xb8] sm:$0xff]  }
 0x4fb   : > { %1306 = vmatprep.mubr.bf16.mxu1 %v2529_v22  ;;  %v2182_v22 = vld [vmem:[#allocation11 + $0xe4] ss:$16 sps:$4 sm:$0xff]   ;;  %1275 = vmatpush1.bf16.msra.mxu1 %v2183_v53 }
 0x4fc   : > { %1233 = vmatprep.subr.bf16.mxu0 %v2182_v22  ;;  %1276 = vmatprep.subr.bf16.mxu1 %v2191_v56  ;;  %v2242_v22 = vld [vmem:[#allocation12 + $0x20] sm:$0xff]   ;;  %v2246_v56 = vld [vmem:[#allocation12 + $0x18] sm:$0xff]  }
 0x4fd   : > { %1234 = vmatpush1.bf16.msra.mxu0 %v2180_v52  ;;  %v2241_v52 = vld [vmem:[#allocation12 + $0xe0] sm:$0xff]  }
 0x4fe   : > { %1235 = vmatprep.subr.bf16.mxu0 %v2188_v55  ;;  %v2243_v53 = vld [vmem:[#allocation12 + $0xa0] sm:$0xff]   ;;  %v2245_v55 = vld [vmem:[#allocation12 + $0xd8] sm:$0xff]  }
 0x4ff   : > { %1277 = vmatpush1.bf16.msra.mxu1 %v2189_v58  ;;  %v2248_v58 = vld [vmem:[#allocation12 + $0x50] sm:$0xff]  }
 0x500   : > { %1278 = vmatprep.subr.bf16.mxu1 %v2197_v63  ;;  %v2254_v63 = vld [vmem:[#allocation12 + $0x8] sm:$0xff]  }
 0x501   : > { %1236 = vmatpush1.bf16.msra.mxu0 %v2186_v57  ;;  %v2247_v57 = vld [vmem:[#allocation12 + $0x98] sm:$0xff]  }
 0x502   : > { %1237 = vmatprep.subr.bf16.mxu0 %v2194_v62  ;;  %v2253_v62 = vld [vmem:[#allocation12 + $0xc8] sm:$0xff]  }
 0x503   : > { %1279 = vmatpush1.bf16.msra.mxu1 %v2195_v2  ;;  %v2256_v2 = vld [vmem:[#allocation12 + $0x40] sm:$0xff]  }
 0x504   : > { %1280 = vmatprep.subr.bf16.mxu1 %v2203_v7  ;;  %v1051_v7 = vld [vmem:[%s2899_s8] sm:$0xf] }
 0x505   : > { %1238 = vmatpush1.bf16.msra.mxu0 %v2192_v1  ;;  %v2255_v1 = vld [vmem:[#allocation12 + $0x88] sm:$0xff]  }
 0x506   : > { %1239 = vmatprep.subr.bf16.mxu0 %v2200_v5  ;;  %v2258_v5 = vld [vmem:[#allocation12] sm:$0xff]  }
 0x507   : > { %1281 = vmatpush1.bf16.msra.mxu1 %v2201_v6  ;;  %v2259_v6 = vld [vmem:[#allocation12 + $0x80] sm:$0xff]  }
 0x508   : > { %1282 = vmatprep.subr.bf16.mxu1 %v2209_v9  ;;  %v1056_v9 = vrot.slane %v1051_v7, %v538_v46 }
 0x509   : > { %1240 = vmatpush1.bf16.msra.mxu0 %v2198_v4  ;;  %v2257_v4 = vld [vmem:[#allocation12 + $0xc0] sm:$0xff]  }
 0x50a   : > { %1241 = vmatprep.subr.bf16.mxu0 %v2206_v8  ;;  %v1067_v8 = vsub.s32 3, %v2790_v42 }
 0x50b   : > { %1283 = vmatpush1.bf16.msra.mxu1 %v2207_v11 }
 0x50c   : > { %1284 = vmatprep.subr.bf16.mxu1 %v2215_v13  ;;  %v1060_v13 = vrot.slane %v1051_v7, %v542_v45 }
 0x50d   : > { %1242 = vmatpush1.bf16.msra.mxu0 %v2204_v10  ;;  %v1064_v10 = vrot.slane %v1051_v7, %v546_v43 }
 0x50e   : > { %1243 = vmatprep.subr.bf16.mxu0 %v2212_v12 }
 0x50f   : > { %1285 = vmatpush1.bf16.msra.mxu1 %v2213_v15 }
 0x510   : > { %1286 = vmatprep.subr.bf16.mxu1 %v2221_v17 }
 0x511   : > { %1244 = vmatpush1.bf16.msra.mxu0 %v2210_v14  ;;  %v1068_v14 = vrot.slane %v1051_v7, %v1067_v8 }
 0x512   : > { %1245 = vmatprep.subr.bf16.mxu0 %v2218_v16 }
 0x513   : > { %1287 = vmatpush1.bf16.msra.mxu1 %v2219_v19 }
 0x514   : > { %1288 = vmatprep.subr.bf16.mxu1 %v2227_v21 }
 0x515   : > { %1246 = vmatpush1.bf16.msra.mxu0 %v2216_v18 }
 0x516   : > { %1247 = vmatprep.subr.bf16.mxu0 %v2224_v20 }
 0x517   : > { %1289 = vmatpush1.bf16.msra.mxu1 %v2225_v24 }
 0x518   : > { %1975 = vmatprep.subr.bf16.mxu1 %v2229_v26 }
 0x519   : > { %1248 = vmatpush1.bf16.msra.mxu0 %v2222_v23 }
 0x51a   : > { %1953 = vmatprep.subr.bf16.mxu0 %v2228_v25 }
 0x547   : > { %v864_v38 = vpop.f32.mrf.mxu1 }
 0x549   : > { %v2027_v39 = vpop.f32.mrf.mxu1 }
 0x54a   : > { %v2232_v39 = vld [vmem:[#allocation12 + $0x70] sm:$0xff]  }
 0x54b   : > { %v867_v40 = vpop.f32.mrf.mxu1 }
 0x54c   : > { %v2233_v40 = vld [vmem:[#allocation12 + $0xf0] sm:$0xff]  }
 0x54d   : > { %v2028_v41 = vpop.f32.mrf.mxu1 }
 0x54e   : > { %v2234_v41 = vld [vmem:[#allocation12 + $0x30] sm:$0xff]  }
 0x5ba   : > { %v977_v44 = vpop.f32.mrf.mxu1 }
 0x5bb   : > { %984 = vrot.lane.b32.xlu0 %v977_v44, %s2531_s24  ;;  %v2235_v44 = vld [vmem:[#allocation12 + $0xb0] sm:$0xff]   ;;  %s1697_s24 = scalar_lea.hbm %s2902_s11, %s1933_s13 }
 0x5bc   : > { %v2039_v3 = vpop.f32.mrf.mxu1 }
 0x5bd   : > { %v2236_v3 = vld [vmem:[#allocation12 + $0x68] sm:$0xff]  }
 0x5be   : > { %v980_v47 = vpop.f32.mrf.mxu1 }
 0x5bf   : > { %v2237_v47 = vld [vmem:[#allocation12 + $0xe8] sm:$0xff]  }
 0x5c0   : > { %v2040_v48 = vpop.f32.mrf.mxu1 }
 0x5c1   : > { %v2238_v48 = vld [vmem:[#allocation12 + $0x28] sm:$0xff]  }
 0x62d   : > { %v985_v49 = vpop.permute.xlu0 %984 }
 0x62e   : > { %v987_v50 = vsel %vm763_vm2, %v864_v38, %v985_v49  ;;  %v2239_v49 = vld [vmem:[#allocation12 + $0xa8] sm:$0xff]  }
 0x62f   : > { %v2830_v51 = vadd.f32 %v987_v50, %v2769_v0  ;;  %v2240_v50 = vld [vmem:[#allocation12 + $0x60] sm:$0xff]  }
 0x631   : > { %993 = vadd.xlane.f32.xlu1 %v2830_v51 }
 0x6ba   : > { %v994_v0 = vpop.xlane.xlu1 %993 }
 0x6bb   : > { %v995_v59 = vmul.f32 0.0078125, %v994_v0  ;;  %v2249_v0 = vld [vmem:[#allocation12 + $0xd0] sm:$0xff]  }
 0x6bd   : > { %v996_v60 = vsub.f32 %v2830_v51, %v995_v59  ;;  %v2250_v59 = vld [vmem:[#allocation12 + $0x10] sm:$0xff]  }
 0x6bf   : > { %v997_v61 = vmul.f32 %v996_v60, %v996_v60 }
 0x6c1   : > { %998 = vadd.xlane.f32.xlu0 %v997_v61  ;;  %v2252_v61 = vld [vmem:[#allocation12 + $0x48] sm:$0xff]  }
 0x74a   : > { %v999_v27 = vpop.xlane.xlu0 %998 }
 0x74b   : > { %v1000_v28 = vmul.f32 0.0078125, %v999_v27 }
 0x74d   : > { %v1001_v29 = vadd.f32 1e-05, %v1000_v28 }
 0x74f   : > { %2270 = vrsqrt.f32 %v1001_v29 }
 0x75c   : > { %v2271_v30 = vpop.eup %2270 }
 0x75d   : > { %v1003_v32 = vmul.f32 %v2271_v30, %v996_v60  ;;  %v2251_v60 = vld [vmem:[#allocation12 + $0x90] sm:$0xff]  }
 0x75f   : > { %v1010_v34 = vmul.f32 %v1865_v31, %v1003_v32 }
 0x761   : > { %v1017_v35 = vadd.f32 %v1866_v33, %v1010_v34 }
 0x763   : > { %v1018_v38 = vpack.c.bf16 %v1017_v35, %v1017_v35 }
 0x765   : > { %1266 = vmatmul.mubr.bf16.vlgmr.msra.gmra.mxu0 %v1018_v38  ;;  %1307 = vmatmul.mubr.bf16.vlgmr.msra.gmra.mxu1 %v1018_v38 }
 0x766   : > { %1954 = vmatpush3.bf16.msra.mxu0 %v2230_v36  ;;  %1976 = vmatpush3.bf16.msra.mxu1 %v2231_v37 }
 0x767   : > { %1955 = vmatprep.subr.bf16.mxu0 %v2232_v39  ;;  %1977 = vmatprep.subr.bf16.mxu1 %v2233_v40 }
 0x76a   : > { %1956 = vmatpush3.bf16.msra.mxu0 %v2234_v41  ;;  %1978 = vmatpush3.bf16.msra.mxu1 %v2235_v44 }
 0x76b   : > { %1957 = vmatprep.subr.bf16.mxu0 %v2236_v3  ;;  %1979 = vmatprep.subr.bf16.mxu1 %v2237_v47 }
 0x76e   : > { %1958 = vmatpush3.bf16.msra.mxu0 %v2238_v48  ;;  %1980 = vmatpush3.bf16.msra.mxu1 %v2239_v49 }
 0x76f   : > { %1959 = vmatprep.subr.bf16.mxu0 %v2240_v50  ;;  %1981 = vmatprep.subr.bf16.mxu1 %v2241_v52 }
 0x772   : > { %1960 = vmatpush3.bf16.msra.mxu0 %v2242_v22  ;;  %1982 = vmatpush3.bf16.msra.mxu1 %v2243_v53  ;;  %v1899_v53 = vld [vmem:[%s2901_s10] ss:$0 sm:$0xff] }
 0x773   : > { %1961 = vmatprep.subr.bf16.mxu0 %v2244_v54  ;;  %1983 = vmatprep.subr.bf16.mxu1 %v2245_v55 }
 0x776   : > { %1962 = vmatpush3.bf16.msra.mxu0 %v2246_v56  ;;  %1984 = vmatpush3.bf16.msra.mxu1 %v2247_v57 }
 0x777   : > { %1963 = vmatprep.subr.bf16.mxu0 %v2248_v58  ;;  %1985 = vmatprep.subr.bf16.mxu1 %v2249_v0  ;;  %v1342_v58 = vadd.f32 %v1899_v53, %v2830_v51 }
 0x77a   : > { %1964 = vmatpush3.bf16.msra.mxu0 %v2250_v59  ;;  %1986 = vmatpush3.bf16.msra.mxu1 %v2251_v60 }
 0x77b   : > { %1965 = vmatprep.subr.bf16.mxu0 %v2252_v61  ;;  %1987 = vmatprep.subr.bf16.mxu1 %v2253_v62 }
 0x77e   : > { %1966 = vmatpush3.bf16.msra.mxu0 %v2254_v63  ;;  %1988 = vmatpush3.bf16.msra.mxu1 %v2255_v1 }
 0x77f   : > { %1967 = vmatprep.subr.bf16.mxu0 %v2256_v2  ;;  %1989 = vmatprep.subr.bf16.mxu1 %v2257_v4 }
 0x782   : > { %1968 = vmatpush3.bf16.msra.mxu0 %v2258_v5  ;;  %1990 = vmatpush3.bf16.msra.mxu1 %v2259_v6 }
 0x825   : > { %v1267_v11 = vpop.f32.mrf.mxu0  ;;  %v1308_v12 = vpop.f32.mrf.mxu1 }
 0x826   : > { %v1268_v15 = vadd.f32 %v1267_v11, %v1056_v9  ;;  %v1309_v16 = vadd.f32 %v1308_v12, %v1064_v10 }
 0x827   : > { %v1269_v17 = vpop.f32.mrf.mxu0  ;;  %v1310_v18 = vpop.f32.mrf.mxu1 }
 0x828   : > { %v1319_v19 = vmul.f32 0.70710677, %v1268_v15  ;;  %v1321_v20 = vmul.f32 0.70710677, %v1309_v16  ;;  %v1270_v21 = vadd.f32 %v1269_v17, %v1060_v13  ;;  %v1311_v23 = vadd.f32 %v1310_v18, %v1068_v14 }
 0x829   : > { %v1271_v24 = vpop.f32.mrf.mxu0  ;;  %v1312_v25 = vpop.f32.mrf.mxu1  ;;  %v1315_v31 = vmul.f32 0.5, %v1268_v15  ;;  %v1317_v33 = vmul.f32 0.5, %v1309_v16 }
 0x82a   : > { %2272 = verf.f32 %v1319_v19  ;;  %v1320_v46 = vmul.f32 0.70710677, %v1270_v21  ;;  %v1322_v27 = vmul.f32 0.70710677, %v1311_v23  ;;  %v1316_v34 = vmul.f32 0.5, %v1270_v21 }
 0x82b   : > { %2274 = verf.f32 %v1321_v20  ;;  %v1272_v43 = vpop.f32.mrf.mxu0  ;;  %v1313_v26 = vpop.f32.mrf.mxu1  ;;  %v1318_v37 = vmul.f32 0.5, %v1311_v23 }
 0x82c   : > { %2276 = verf.f32 %v1320_v46 }
 0x82d   : > { %2278 = verf.f32 %v1322_v27 }
 0x837   : > { %v2273_v42 = vpop.eup %2272 }
 0x838   : > { %v2275_v45 = vpop.eup %2274  ;;  %v1327_v28 = vadd.f32 1.0, %v2273_v42 }
 0x839   : > { %v1329_v29 = vadd.f32 1.0, %v2275_v45  ;;  %v2277_v30 = vpop.eup %2276 }
 0x83a   : > { %v2279_v32 = vpop.eup %2278  ;;  %v1328_v35 = vadd.f32 1.0, %v2277_v30  ;;  %v1331_v36 = vmul.f32 %v1327_v28, %v1315_v31 }
 0x83b   : > { %v1330_v38 = vadd.f32 1.0, %v2279_v32  ;;  %v1333_v39 = vmul.f32 %v1329_v29, %v1317_v33 }
 0x83c   : > { %v1332_v40 = vmul.f32 %v1328_v35, %v1316_v34  ;;  %v1343_v3 = vpack.c.bf16 %v1331_v36, %v1331_v36 }
 0x83d   : > { %v1334_v41 = vmul.f32 %v1330_v38, %v1318_v37  ;;  %v1345_v48 = vpack.c.bf16 %v1333_v39, %v1333_v39 }
 0x83e   : > { %v1344_v44 = vpack.c.bf16 %v1332_v40, %v1332_v40 }
 0x83f   : > { %v1346_v47 = vpack.c.bf16 %v1334_v41, %v1334_v41 }
 0x840   : > { %1635 = vmatprep.mubr.bf16.mxu0 %v1344_v44 }
 0x841   : > { %1675 = vmatprep.mubr.bf16.mxu1 %v1346_v47  ;;  %1636 = vmatmul.mubr.bf16.vlgmr.msra.gmra.mxu0 %v1343_v3 }
 0x842   : > { %1676 = vmatmul.mubr.bf16.vlgmr.msra.gmra.mxu1 %v1345_v48 }
 0x901   : > { %v1969_v49 = vpop.f32.mrf.mxu0 }
 0x902   : > { %v1991_v50 = vpop.f32.mrf.mxu1 }
 0x903   : > { %v1970_v52 = vpop.f32.mrf.mxu0 }
 0x904   : > { %v1971_v22 = vadd.f32 %v1970_v52, %v1969_v49  ;;  %v1992_v54 = vpop.f32.mrf.mxu1 }
 0x905   : > { %v1993_v55 = vadd.f32 %v1992_v54, %v1991_v50  ;;  %v1972_v56 = vpop.f32.mrf.mxu0 }
 0x906   : > { %v1994_v57 = vpop.f32.mrf.mxu1 }
 0x907   : > { %v1678_v0 = vadd.f32 %v1993_v55, %v1971_v22  ;;  %v1973_v59 = vpop.f32.mrf.mxu0 }
 0x908   : > { %v1995_v60 = vpop.f32.mrf.mxu1 }
 0x909   : > { %v1683_v61 = vadd.f32 %v1678_v0, %v1342_v58 }
 0x90b   : > { %1684 = vst [vmem:[%s470_s9] sm:$0xff] %v1683_v61 }
 0x90c   : > { %2451 = shalt.err (!%p2448_p1)
}
 0x90d   : > { %s2452_s30 = scalar_lea.hbm %s1697_s24, 128  ;;  %s2456_s16 = scalar_lea.hbm %s2902_s11, 256 }
 0x90e   : > { %p2453_p3 = scmp.ne.s32.totalorder %s1697_s24, %s2452_s30  ;;  %p2457_p6 = scmp.lt.s32.totalorder %s1697_s24, %s2902_s11 }
 0x90f   : > { %p2458_p5 = scmp.lt.s32.totalorder %s2456_s16, %s2452_s30 }
 0x910   : > { %p2454_p4 = pnand %p2453_p3, %p2933_p10 }
 0x911   : > { %p2459_p7 = por %p2458_p5, %p2457_p6 }
 0x912   : > { %p2455_p12 = pneg %p2454_p4 }
 0x914   : > { %p2460_p8 = pnand %p2459_p7, %p2455_p12 }
 0x916   : > { %2463 = shalt.err (!%p2460_p8)
}
 0x917   : > { %2063 = dma.vmem_to_hbm [thread:$0]  (%p2933_p10), %s1700_s29, 128, %s1697_s24, %s1686_s27  }
 0x918 PF: > { %s1711_s13 = sand.u32 1, %s2502_s17   ;;  %p2934_p13 = scmp.ne.s32.totalorder %s2923_s14, 0 }
 0x919   : > { %p2935_p0 = scmp.ge.s32.totalorder %s2514_s20, 2  ;;  %s1712_s9 = scalar_lea.sflag [#allocation5], %s1711_s13 }
 0x91b   : > { %p2086_p2 = pnand %p2935_p0, %p2934_p13 }
 0x91d   : > { %p2087_p9 = pneg %p2086_p2 }
 0x91f   : > { %2497 = dma.done.wait (%p2087_p9), %s1712_s9, 128  }
 0x920   : > { %2499 = vsyncadd (%p2087_p9), %s1712_s9, 4294967168  ;;  %s2936_s1 = sld [smem:[#allocation20_spill]]  ;;  %p27_p11 = scmp.ge.s32.totalorder %s2690_s22, 4  }
 0x921   : > { %s2937_s17 = smov %s2506_s18  ;;  %s2938_s18 = smov %s2510_s19 }
 0x922   : > { %s2940_s20 = smov %s2690_s22  ;;  %29 = sbr.rel (!%p27_p11) target bundleno = 14 (0xe), region = 129 }
 0x926   : > { %s2939_s19 = smov %s2936_s1 }
 0x927   :  { %1717 = vsyncpa [#allocation4], 1 }
 0x928   :  { %1719 = vsyncpa [#allocation4 + $0x1], 1 }
 0x929   :  { %1720 = vsyncpa [#allocation7], 1 }
 0x92a   :  { %1721 = vsyncpa [#allocation10], 1 }
 0x92b   :  { %1722 = vsyncpa [#allocation13], 1 }
 0x92c   :  { %1723 = vsyncpa [#allocation5], 1 }
 0x92d   :  { %1725 = vsyncpa [#allocation5 + $0x1], 1 }

// kernel: tpu_custom_call.1
= control target key start
LH: loop header
LB: loop body
LE: loop exit
PB: predicated region body
PF: predicated region fallthrough
CT: control target
= control target key end

     0   :  { %s2891_s0 = inlined_call_operand.hbm [shape: f32[2,8,128], index: 0, kind: input, shape index: {}]   ;;  %s2892_s1 = inlined_call_operand.hbm [shape: f32[1,128], index: 1, kind: input, shape index: {}]   ;;  %s2893_s2 = inlined_call_operand.hbm [shape: f32[1,128], index: 2, kind: input, shape index: {}]   ;;  %s2894_s3 = inlined_call_operand.hbm [shape: bf16[1,128,384], index: 3, kind: input, shape index: {}]   ;;  %s2895_s4 = inlined_call_operand.vmem [shape: f32[1,1,384], index: 4, kind: input, shape index: {}]   ;;  %s2896_s5 = inlined_call_operand.vmem [shape: f32[1,128], index: 5, kind: input, shape index: {}]   ;;  %s2897_s6 = inlined_call_operand.vmem [shape: f32[1,128], index: 6, kind: input, shape index: {}]   ;;  %s2898_s7 = inlined_call_operand.hbm [shape: bf16[1,128,512], index: 7, kind: input, shape index: {}]   ;;  %s2899_s8 = inlined_call_operand.vmem [shape: f32[1,1,512], index: 8, kind: input, shape index: {}]   ;;  %s2900_s9 = inlined_call_operand.hbm [shape: bf16[1,512,128], index: 9, kind: input, shape index: {}]   ;;  %s2901_s10 = inlined_call_operand.vmem [shape: f32[1,128], index: 10, kind: input, shape index: {}]   ;;  %s2902_s11 = inlined_call_operand.hbm [shape: f32[2,8,128], index: 11, kind: output, shape index: {}]  }
   0x1   :  { %2907 = sst [smem:[#allocation21_spill]] %s2892_s1 }
   0x2   :  { %2908 = sst [smem:[#allocation22_spill]] %s2893_s2 }
   0x3   :  { %2909 = sst [smem:[#allocation23_spill]] %s2894_s3 }
   0x4   :  { %2910 = sst [smem:[#allocation24_spill]] %s2898_s7 }
   0x5   :  { %2911 = sst [smem:[#allocation25_spill]] %s2900_s9 }
   0x6   :  { %16 = vsyncpa [#allocation4], 0 }
   0x7   :  { %18 = vsyncpa [#allocation4 + $0x1], 0 }
   0x8   :  { %19 = vsyncpa [#allocation7], 0 }
   0x9   :  { %20 = vsyncpa [#allocation10], 0 }
   0xa   :  { %21 = vsyncpa [#allocation13], 0 }
   0xb   :  { %22 = vsyncpa [#allocation5], 0 }
   0xc   :  { %24 = vsyncpa [#allocation5 + $0x1], 0  ;;  %s2593_s17 = smov 0   ;;  %s2595_s18 = smov 0  }
   0xd   :  { %s2597_s19 = smov 0   ;;  %s2599_s20 = smov 0  }
   0xe LB: > { %s2516_s21 = smov [#allocation6]   ;;  %s2614_s23 = sadd.s32 4294967295, %s2514_s20   ;;  %s2514_s20 = sphi %s2599_s20, %s2940_s20   ;;  %s2510_s19 = sphi %s2597_s19, %s2939_s19   ;;  %s2506_s18 = sphi %s2595_s18, %s2938_s18   ;;  %s2502_s17 = sphi %s2593_s17, %s2937_s17  }
   0xf   : > { %s310_s22 = sshll.u32 %s2516_s21, 4  ;;  %p1818_p0 = scmp.ge.s32.totalorder %s2514_s20, 1  ;;  %s311_s22 = int_to_ptr.vmem [resolvable:$true] %s310_s22 }
  0x10   : > { %p2903_p1 = scmp.eq.s32.totalorder %s2614_s23, 0  ;;  %p297_p2 = scmp.lt.s32.totalorder %s2514_s20, 3 }
  0x11   : > { %s2517_s25 = smov [#allocation9]   ;;  %s2518_s28 = smov [#allocation8]  }
  0x12   : > { %p2619_p3 = pnand %p1818_p0, %p297_p2  ;;  %s331_s26 = sshll.u32 %s2517_s25, 4  ;;  %s2626_s26 = int_to_ptr.vmem [resolvable:$true] %s331_s26 }
  0x13   : > { %s321_s29 = sshll.u32 %s2518_s28, 4  ;;  %s2291_s12 = scalar_lea.vmem %s311_s22, 16  ;;  %s2634_s29 = int_to_ptr.vmem [resolvable:$true] %s321_s29 }
  0x14   : > { %s2912_s24 = scalar_select %p2619_p3, 1, 0 }
  0x15   : > { %p2065_p5 = pneg %p2619_p3  ;;  %p2292_p8 = scmp.ne.s32.totalorder %s311_s22, %s2291_s12 }
  0x16   : > { %s2298_s13 = scalar_lea.vmem %s311_s22, 32  ;;  %p2299_p11 = scmp.lt.s32.totalorder %s311_s22, %s311_s22 }
  0x17   : > { %p2630_p6 = pnand %p2065_p5, %p2903_p1  ;;  %p2300_p12 = scmp.lt.s32.totalorder %s2298_s13, %s2291_s12 }
  0x19   : > { %p2638_p7 = pneg %p2630_p6  ;;  %p2301_p13 = por %p2300_p12, %p2299_p11 }
  0x1b   : > { %p2294_p9 = pnand %p2292_p8, %p2638_p7 }
  0x1d   : > { %p2295_p10 = pneg %p2294_p9 }
  0x1f   : > { %p2302_p0 = pnand %p2301_p13, %p2295_p10 }
  0x21   : > { %2305 = shalt.err (!%p2302_p0)
}
  0x22   : > { %s2915_s1 = sld [smem:[#allocation21_spill]]  ;;  %s2317_s16 = scalar_lea.vmem %s2626_s26, 3072 }
  0x23   : > { %p2318_p2 = scmp.ne.s32.totalorder %s2626_s26, %s2317_s16  ;;  %p2325_p9 = scmp.lt.s32.totalorder %s2626_s26, %s2626_s26 }
  0x24   : > { %p2326_p11 = scmp.lt.s32.totalorder %s2317_s16, %s2317_s16 }
  0x25   : > { %p2320_p5 = pnand %p2318_p2, %p2638_p7 }
  0x26   : > { %p2327_p10 = por %p2326_p11, %p2325_p9 }
  0x27   : > { %p2321_p8 = pneg %p2320_p5 }
  0x28   : > { %2068 = dma.hbm_to_vmem [thread:$0]  (!%p2630_p6), %s2915_s1, 16, %s311_s22, [#allocation7]  }
  0x29   : > { %p2328_p12 = pnand %p2327_p10, %p2321_p8 }
  0x2b   : > { %2331 = shalt.err (!%p2328_p12)
}
  0x2c   : > { %s2519_s21 = smov 192   ;;  %s2520_s22 = smov 12  }
  0x2d   : > { %s2916_s3 = sld [smem:[#allocation23_spill]]  ;;  %s2343_s12 = scalar_lea.vmem %s2634_s29, 16 }
  0x2e   : > { %p2344_p13 = scmp.ne.s32.totalorder %s2634_s29, %s2343_s12  ;;  %s2350_s13 = scalar_lea.vmem %s2634_s29, 32 }
  0x2f   : > { %p2351_p5 = scmp.lt.s32.totalorder %s2634_s29, %s2634_s29  ;;  %p2352_p8 = scmp.lt.s32.totalorder %s2350_s13, %s2343_s12 }
  0x30   : > { %p2346_p0 = pnand %p2344_p13, %p2638_p7 }
  0x31   : > { %p2353_p9 = por %p2352_p8, %p2351_p5 }
  0x32   : > { %p2347_p2 = pneg %p2346_p0 }
  0x33   : > { %2074 = dma.hbm_to_vmem [thread:$0]  (!%p2630_p6), %s2916_s3, 3072, %s2626_s26, [#allocation10], %s2519_s21, %s2519_s21, %s2520_s22  }
  0x34   : > { %p2354_p11 = pnand %p2353_p9, %p2347_p2 }
  0x36   : > { %2357 = shalt.err (!%p2354_p11)
}
  0x37   : > { %s2917_s2 = sld [smem:[#allocation22_spill]]  ;;  %s2521_s26 = smov [#allocation11]  }
  0x38   : > { %s353_s16 = sshll.u32 %s2521_s26, 4  ;;  %s354_s16 = int_to_ptr.vmem [resolvable:$true] %s353_s16 }
  0x39   : > { %s2369_s21 = scalar_lea.vmem %s354_s16, 4096  ;;  %p2377_p0 = scmp.lt.s32.totalorder %s354_s16, %s354_s16 }
  0x3a   : > { %p2370_p10 = scmp.ne.s32.totalorder %s354_s16, %s2369_s21  ;;  %p2378_p5 = scmp.lt.s32.totalorder %s2369_s21, %s2369_s21 }
  0x3c   : > { %p2372_p12 = pnand %p2370_p10, %p2638_p7  ;;  %p2379_p2 = por %p2378_p5, %p2377_p0 }
  0x3d   : > { %2071 = dma.hbm_to_vmem [thread:$0]  (!%p2630_p6), %s2917_s2, 16, %s2634_s29, [#allocation7]  }
  0x3e   : > { %p2373_p13 = pneg %p2372_p12 }
  0x40   : > { %p2380_p8 = pnand %p2379_p2, %p2373_p13 }
  0x42   : > { %2383 = shalt.err (!%p2380_p8)
}
  0x43   : > { %s2522_s22 = smov 256   ;;  %s2523_s25 = smov 16  }
  0x44   : > { %s2918_s7 = sld [smem:[#allocation24_spill]]  ;;  %s2524_s12 = smov [#allocation12]  }
  0x45   : > { %s369_s13 = sshll.u32 %s2524_s12, 4  ;;  %s370_s13 = int_to_ptr.vmem [resolvable:$true] %s369_s13 }
  0x46   : > { %s2395_s14 = scalar_lea.vmem %s370_s13, 4096  ;;  %p2403_p12 = scmp.lt.s32.totalorder %s370_s13, %s370_s13 }
  0x47   : > { %p2396_p9 = scmp.ne.s32.totalorder %s370_s13, %s2395_s14  ;;  %p2404_p13 = scmp.lt.s32.totalorder %s2395_s14, %s2395_s14 }
  0x49   : > { %p2398_p11 = pnand %p2396_p9, %p2638_p7  ;;  %p2405_p0 = por %p2404_p13, %p2403_p12 }
  0x4a   : > { %2077 = dma.hbm_to_vmem [thread:$0]  (!%p2630_p6), %s2918_s7, 4096, %s354_s16, [#allocation10], %s2522_s22, %s2522_s22, %s2523_s25  }
  0x4b   : > { %p2399_p10 = pneg %p2398_p11 }
  0x4d   : > { %p2406_p5 = pnand %p2405_p0, %p2399_p10 }
  0x4f   : > { %2409 = shalt.err (!%p2406_p5)
}
  0x50   : > { %s2525_s15 = smov 64   ;;  %s2526_s30 = smov 4  }
  0x51   : > { %s2919_s9 = sld [smem:[#allocation25_spill]]  ;;  %s1817_s21 = sadd.s32 4294967294, %s2514_s20  }
  0x52   : > { %s2690_s22 = sadd.s32 1, %s2514_s20   ;;  %s37_s25 = sadd.s32 1, %s2510_s19 }
  0x53   : > { %s34_s28 = ssub.s32 %s2514_s20, %s2690_s22  ;;  %p44_p7 = scmp.ne.s32.totalorder %s2510_s19, %s2506_s18 }
  0x54   : > { %p35_p2 = scmp.eq.s32.totalorder %s34_s28, 0  ;;  %p45_p8 = scmp.eq.s32.totalorder %s2514_s20, 0 }
  0x55   : > { %p50_p9 = scmp.ne.s32.totalorder %s2506_s18, %s2502_s17  ;;  %p284_p11 = scmp.eq.s32.totalorder %s2614_s23, 1 }
  0x56   : > { %s2702_s29 = scalar_select %p35_p2, %s2510_s19, %s37_s25  }
  0x57   : > { %2080 = dma.hbm_to_vmem [thread:$0]  (!%p2630_p6), %s2919_s9, 4096, %s370_s13, [#allocation13], %s2525_s15, %s2525_s15, %s2526_s30  }
  0x58   : > { %2920 = sst [smem:[#allocation20_spill]] %s2702_s29  ;;  %p46_p10 = por %p45_p8, %p44_p7 }
  0x59   : > { %p2706_p12 = por %p2903_p1, %p50_p9  ;;  %p2710_p6 = por %p284_p11, %p44_p7 }
  0x5a   : > { %p290_p13 = scmp.eq.s32.totalorder %s1817_s21, 1  ;;  %p2094_p0 = scmp.lt.s32.totalorder %s2514_s20, 2 }
  0x5b   : > { %s2921_s27 = scalar_select %p2706_p12, 1, 0 }
  0x5c   : > { %s2922_s12 = scalar_select %p2710_p6, 1, 0 }
  0x5d   : > { %s386_s13 = sand.u32 1, %s2510_s19   ;;  %p2716_p5 = por %p290_p13, %p50_p9 }
  0x5e   : > { %s1825_s15 = sshll.u32 %s386_s13, 3  ;;  %s1826_s30 = sshll.u32 %s2514_s20, 7 }
  0x5f   : > { %s2923_s14 = scalar_select %p2716_p5, 1, 0 }
  0x60   : > { %s2724_s25 = scalar_lea.hbm %s2891_s0, %s1826_s30  ;;  %s390_s28 = scalar_lea.vmem [#allocation3], %s1825_s15 }
  0x61   : > { %s397_s1 = sshll.u32 %s390_s28, 4  ;;  %p2726_p7 = pnand %p2094_p0, %p46_p10  ;;  %s398_s1 = int_to_ptr.vmem [resolvable:$true] %s397_s1 }
  0x62   : > { %s387_s2 = scalar_lea.sflag [#allocation4], %s386_s13  ;;  %s2410_s3 = scalar_lea.hbm %s2724_s25, 128 }
  0x63   : > { %p2411_p2 = scmp.ne.s32.totalorder %s2724_s25, %s2410_s3  ;;  %p2412_p8 = pneg %p2726_p7 }
  0x64   : > { %s2415_s16 = scalar_lea.hbm %s2891_s0, 256  ;;  %p2416_p10 = scmp.lt.s32.totalorder %s2724_s25, %s2891_s0 }
  0x65   : > { %p2413_p9 = pnand %p2412_p8, %p2411_p2  ;;  %p2417_p13 = scmp.lt.s32.totalorder %s2415_s16, %s2410_s3 }
  0x67   : > { %p2414_p11 = pneg %p2413_p9  ;;  %p2418_p0 = por %p2417_p13, %p2416_p10 }
  0x69   : > { %p2419_p4 = pnand %p2418_p0, %p2414_p11 }
  0x6b   : > { %2422 = shalt.err (!%p2419_p4)
}
  0x6c   : > { %s2423_s28 = scalar_lea.vmem %s398_s1, 128  ;;  %s2527_s13 = smov [#allocation3]  }
  0x6d   : > { %p2424_p1 = scmp.ne.s32.totalorder %s398_s1, %s2423_s28  ;;  %s2428_s9 = sshll.u32 %s2527_s13, 4  ;;  %s2429_s9 = int_to_ptr.vmem [resolvable:$false] %s2428_s9 }
  0x6e   : > { %s2430_s29 = scalar_lea.vmem %s2429_s9, 256  ;;  %p2431_p2 = scmp.lt.s32.totalorder %s398_s1, %s2429_s9 }
  0x6f   : > { %p2426_p5 = pnand %p2424_p1, %p2412_p8  ;;  %p2432_p9 = scmp.lt.s32.totalorder %s2430_s29, %s2423_s28 }
  0x71   : > { %p2427_p6 = pneg %p2426_p5  ;;  %p2433_p12 = por %p2432_p9, %p2431_p2 }
  0x73   : > { %p2434_p3 = pnand %p2433_p12, %p2427_p6 }
  0x75   : > { %2437 = shalt.err (!%p2434_p3)
}
  0x76   : > { %2084 = dma.hbm_to_vmem [thread:$0]  (!%p2726_p7), %s2724_s25, 128, %s398_s1, %s387_s2  }
  0x77   : > { %p2925_p11 = scmp.ne.s32.totalorder %s2912_s24, 0 }
  0x78   : > { %s2747_s3 = sand.u32 (!%p2925_p11), 1, %s2506_s18   ;;  %p2926_p1 = scmp.ne.s32.totalorder (!%p2925_p11), %s2921_s27, 0 }
  0x79   : > { %406 = sbr.rel (%p2925_p11) target bundleno = 2328 (0x918), region = 64  ;;  %s1828_s7 = sshll.u32 (!%p2925_p11), %s2747_s3, 3 }
  0x7a   : > { %s409_s9 = scalar_lea.sflag (!%p2925_p11), [#allocation4], %s2747_s3  ;;  %s412_s29 = scalar_lea.vmem (!%p2925_p11), [#allocation3], %s1828_s7 }
  0x7e   : > { %2481 = dma.done.wait (%p2926_p1), %s409_s9, 128  }
  0x7f   : > { %2483 = vsyncadd (%p2926_p1), %s409_s9, 4294967168  ;;  %p2927_p3 = scmp.eq.s32.totalorder %s2614_s23, 0 }
  0x81   : > { %2485 = dma.done.wait (%p2927_p3), [#allocation7], 32   ;;  %p2928_p4 = pmov %p2927_p3 }
  0x82   : > { %p2929_p12 = pmov %p2927_p3 }
  0x83   : > { %2487 = vsyncadd (%p2928_p4), [#allocation7], 4294967264 }
  0x84   : > { %2489 = dma.done.wait (%p2929_p12), [#allocation10], 7168   ;;  %p2930_p6 = pmov %p2927_p3 }
  0x85   : > { %p2931_p5 = pmov %p2927_p3 }
  0x86   : > { %2491 = vsyncadd (%p2930_p6), [#allocation10], 4294960128 }
  0x87   : > { %2493 = dma.done.wait (%p2931_p5), [#allocation13], 4096   ;;  %p2932_p7 = pmov %p2927_p3 }
  0x88   : > { %v2769_v0 = vld [vmem:[%s412_s29] sm:$0xff]  ;;  %v2528_v3 = vmov 0.0   ;;  %v2156_v12 = vld [vmem:[#allocation9 + $0x7c] ss:$12 sps:$4 sm:$0xff]   ;;  %v2529_v22 = vmov 0   ;;  %vm2530_vm0 = vmmov 0   ;;  %v536_v41 = vlaneseq }
  0x89   : > { %2495 = vsyncadd (%p2932_p7), [#allocation13], 4294963200  ;;  %475 = vadd.xlane.f32.xlu0 %v2769_v0  ;;  %v2148_v1 = vld [vmem:[#allocation9 + $0xac] ss:$12 sps:$4 sm:$0xff]   ;;  %v2150_v2 = vld [vmem:[#allocation9 + $0xa8] ss:$12 sps:$4 sm:$0xff]   ;;  %1997 = vmatprep.subr.bf16.mxu1 %v2528_v3 }
  0x8a   : > { %v2151_v4 = vld [vmem:[#allocation9 + $0xb0] ss:$12 sps:$4 sm:$0xff]   ;;  %v2152_v5 = vld [vmem:[#allocation9 + $0x94] ss:$12 sps:$4 sm:$0xff]   ;;  %679 = vmatprep.subr.bf16.mxu0 %v2148_v1  ;;  %v2155_v7 = vld [vmem:[#allocation9 + $0x98] ss:$12 sps:$4 sm:$0xff]   ;;  %711 = vmatprep.mubr.bf16.mxu0 %v2529_v22 }
  0x8b   : > { %v2154_v6 = vld [vmem:[#allocation9 + $0x90] ss:$12 sps:$4 sm:$0xff]   ;;  %680 = vmatpush1.bf16.msra.mxu0 %v2150_v2  ;;  %1998 = vmatpush3.bf16.msra.mxu1 %v2151_v4  ;;  %v2158_v13 = vld [vmem:[#allocation9 + $0x78] ss:$12 sps:$4 sm:$0xff]   ;;  %v2159_v14 = vld [vmem:[#allocation9 + $0x80] ss:$12 sps:$4 sm:$0xff]  }
  0x8c   : > { %681 = vmatprep.subr.bf16.mxu0 %v2152_v5  ;;  %1999 = vmatprep.subr.bf16.mxu1 %v2528_v3  ;;  %v2160_v15 = vld [vmem:[#allocation9 + $0x64] ss:$12 sps:$4 sm:$0xff]   ;;  %v2162_v16 = vld [vmem:[#allocation9 + $0x60] ss:$12 sps:$4 sm:$0xff]   ;;  %v2163_v17 = vld [vmem:[#allocation9 + $0x68] ss:$12 sps:$4 sm:$0xff]  }
  0x8d   : > { %v2164_v18 = vld [vmem:[#allocation9 + $0x4c] ss:$12 sps:$4 sm:$0xff]   ;;  %v2166_v19 = vld [vmem:[#allocation9 + $0x48] ss:$12 sps:$4 sm:$0xff]   ;;  %v2167_v20 = vld [vmem:[#allocation9 + $0x50] ss:$12 sps:$4 sm:$0xff]   ;;  %2013 = vmatprep.mubr.msk.bf16.mxu1 %vm2530_vm0, %v2528_v3 }
  0x8e   : > { %v2168_v21 = vld [vmem:[#allocation9 + $0x34] ss:$12 sps:$4 sm:$0xff]   ;;  %v2170_v23 = vld [vmem:[#allocation9 + $0x30] ss:$12 sps:$4 sm:$0xff]   ;;  %v2171_v24 = vld [vmem:[#allocation9 + $0x38] ss:$12 sps:$4 sm:$0xff]  }
  0x8f   : > { %682 = vmatpush1.bf16.msra.mxu0 %v2154_v6  ;;  %2000 = vmatpush3.bf16.msra.mxu1 %v2155_v7  ;;  %v2172_v25 = vld [vmem:[#allocation9 + $0x1c] ss:$12 sps:$4 sm:$0xff]   ;;  %v2174_v26 = vld [vmem:[#allocation9 + $0x18] ss:$12 sps:$4 sm:$0xff]   ;;  %v2175_v27 = vld [vmem:[#allocation9 + $0x20] ss:$12 sps:$4 sm:$0xff]  }
  0x90   : > { %2001 = vmatprep.subr.bf16.mxu1 %v2528_v3  ;;  %683 = vmatprep.subr.bf16.mxu0 %v2156_v12  ;;  %v2176_v28 = vld [vmem:[#allocation9 + $0x4] ss:$12 sps:$4 sm:$0xff]   ;;  %v2178_v29 = vld [vmem:[#allocation9] ss:$12 sps:$4 sm:$0xff]   ;;  %v2179_v30 = vld [vmem:[#allocation9 + $0x8] ss:$12 sps:$4 sm:$0xff]  }
  0x91   : > { %v1835_v35 = vld [vmem:[#allocation6] ss:$0 sm:$0xff]  ;;  %v1836_v37 = vld [vmem:[#allocation8] ss:$0 sm:$0xff]  ;;  %v2790_v42 = vshrl.u32 %v536_v41, 7  ;;  %vm826_vm1 = vcmask 1043456  }
  0x92   : > { %v534_v44 = vld [vmem:[%s2895_s4] sm:$0x7]  ;;  %vm763_vm2 = vcmask 523264   ;;  %s2531_s24 = smov 64   ;;  %vm810_vm3 = vcmask 64512   ;;  %s1933_s13 = sshll.u32 %s2614_s23, 7 }
  0x93   : > { %684 = vmatpush1.bf16.msra.mxu0 %v2158_v13  ;;  %2002 = vmatpush3.bf16.msra.mxu1 %v2159_v14  ;;  %v546_v43 = vsub.s32 2, %v2790_v42  ;;  %v542_v45 = vsub.s32 1, %v2790_v42  ;;  %v538_v46 = vsub.s32 0, %v2790_v42  ;;  %s470_s9 = scalar_lea.vmem [#allocation14], %s1828_s7  ;;  %s1686_s27 = scalar_lea.sflag [#allocation5], %s2747_s3 }
  0x94   : > { %2003 = vmatprep.subr.bf16.mxu1 %v2528_v3  ;;  %685 = vmatprep.subr.bf16.mxu0 %v2160_v15  ;;  %s1699_s29 = sshll.u32 %s470_s9, 4  ;;  %p2933_p10 = scmp.ne.s32.totalorder %s2922_s12, 0  ;;  %s1700_s29 = int_to_ptr.vmem [resolvable:$true] %s1699_s29 }
  0x95   : > { %v547_v47 = vrot.slane %v534_v44, %v546_v43  ;;  %v543_v48 = vrot.slane %v534_v44, %v542_v45  ;;  %v539_v51 = vrot.slane %v534_v44, %v538_v46  ;;  %s2438_s25 = scalar_lea.vmem %s1700_s29, 128  ;;  %s2532_s23 = smov [#allocation14]  }
  0x96   : > { %p2439_p8 = scmp.ne.s32.totalorder %s1700_s29, %s2438_s25  ;;  %s2442_s7 = sshll.u32 %s2532_s23, 4  ;;  %s2443_s7 = int_to_ptr.vmem [resolvable:$false] %s2442_s7 }
  0x97   : > { %686 = vmatpush1.bf16.msra.mxu0 %v2162_v16  ;;  %2004 = vmatpush3.bf16.msra.mxu1 %v2163_v17  ;;  %s2444_s21 = scalar_lea.vmem %s2443_s7, 256  ;;  %p2445_p2 = scmp.lt.s32.totalorder %s1700_s29, %s2443_s7 }
  0x98   : > { %687 = vmatprep.subr.bf16.mxu0 %v2164_v18  ;;  %2005 = vmatprep.subr.bf16.mxu1 %v2528_v3  ;;  %p2440_p13 = pnand %p2439_p8, %p2933_p10  ;;  %p2446_p9 = scmp.lt.s32.totalorder %s2444_s21, %s2438_s25 }
  0x9a   : > { %p2441_p0 = pneg %p2440_p13  ;;  %p2447_p11 = por %p2446_p9, %p2445_p2 }
  0x9b   : > { %688 = vmatpush1.bf16.msra.mxu0 %v2166_v19  ;;  %2006 = vmatpush3.bf16.msra.mxu1 %v2167_v20 }
  0x9c   : > { %689 = vmatprep.subr.bf16.mxu0 %v2168_v21  ;;  %2007 = vmatprep.subr.bf16.mxu1 %v2528_v3  ;;  %p2448_p1 = pnand %p2447_p11, %p2441_p0 }
  0x9f   : > { %690 = vmatpush1.bf16.msra.mxu0 %v2170_v23  ;;  %2008 = vmatpush3.bf16.msra.mxu1 %v2171_v24 }
  0xa0   : > { %691 = vmatprep.subr.bf16.mxu0 %v2172_v25  ;;  %2009 = vmatprep.subr.bf16.mxu1 %v2528_v3 }
  0xa3   : > { %692 = vmatpush1.bf16.msra.mxu0 %v2174_v26  ;;  %2010 = vmatpush3.bf16.msra.mxu1 %v2175_v27 }
  0xa4   : > { %693 = vmatprep.subr.bf16.mxu0 %v2176_v28  ;;  %2011 = vmatprep.subr.bf16.mxu1 %v2528_v3 }
  0xa7   : > { %694 = vmatpush1.bf16.msra.mxu0 %v2178_v29  ;;  %2012 = vmatpush3.bf16.msra.mxu1 %v2179_v30 }
  0xa8   : > { %2023 = vmatprep.subr.bf16.mxu1 %v2528_v3  ;;  %2017 = vmatprep.subr.bf16.mxu0 %v2528_v3 }
 0x112   : > { %v476_v8 = vpop.xlane.xlu0 %475 }
 0x113   : > { %v478_v9 = vmul.f32 0.0078125, %v476_v8 }
 0x115   : > { %v479_v10 = vsub.f32 %v2769_v0, %v478_v9 }
 0x117   : > { %v480_v11 = vmul.f32 %v479_v10, %v479_v10 }
 0x119   : > { %481 = vadd.xlane.f32.xlu0 %v480_v11 }
 0x1a2   : > { %v482_v31 = vpop.xlane.xlu0 %481 }
 0x1a3   : > { %v483_v32 = vmul.f32 0.0078125, %v482_v31 }
 0x1a5   : > { %v484_v33 = vadd.f32 1e-05, %v483_v32 }
 0x1a7   : > { %2260 = vrsqrt.f32 %v484_v33 }
 0x1b4   : > { %v2261_v34 = vpop.eup %2260 }
 0x1b5   : > { %v486_v36 = vmul.f32 %v2261_v34, %v479_v10 }
 0x1b7   : > { %v493_v38 = vmul.f32 %v1835_v35, %v486_v36 }
 0x1b9   : > { %v500_v39 = vadd.f32 %v1836_v37, %v493_v38 }
 0x1bb   : > { %v501_v40 = vpack.c.bf16 %v500_v39, %v500_v39 }
 0x1bd   : > { %712 = vmatmul.mubr.bf16.vlgmr.msra.gmra.mxu0 %v501_v40  ;;  %2014 = vmatmul.mubr.bf16.vlgmr.msra.gmra.mxu1 %v501_v40 }
 0x1be   : > { %2019 = vmatprep.mubr.msk.bf16.mxu0 %vm2530_vm0, %v2528_v3  ;;  %2025 = vmatprep.mubr.msk.bf16.mxu1 %vm2530_vm0, %v2528_v3 }
 0x27d   : > { %v713_v49 = vpop.f32.mrf.mxu0  ;;  %v754_v50 = vpop.f32.mrf.mxu1 }
 0x27e   : > { %v755_v52 = vadd.f32 %v754_v50, %v547_v47  ;;  %v714_v59 = vadd.f32 %v713_v49, %v539_v51 }
 0x27f   : > { %v715_v53 = vpop.f32.mrf.mxu0  ;;  %v2015_v54 = vpop.f32.mrf.mxu1 }
 0x280   : > { %v762_v55 = vpack.c.bf16 %v755_v52, %v755_v52  ;;  %v716_v56 = vadd.f32 %v715_v53, %v543_v48  ;;  %v760_v2 = vpack.c.bf16 %v714_v59, %v714_v59  ;;  %v2180_v52 = vld [vmem:[#allocation11 + $0xe0] ss:$16 sps:$4 sm:$0xff]   ;;  %v2183_v53 = vld [vmem:[#allocation11 + $0xe8] ss:$16 sps:$4 sm:$0xff]   ;;  %v2185_v54 = vld [vmem:[#allocation11 + $0xec] ss:$16 sps:$4 sm:$0xff]  }
 0x281   : > { %v717_v57 = vpop.f32.mrf.mxu0  ;;  %v757_v58 = vpop.f32.mrf.mxu1 }
 0x282   : > { %v828_v60 = vsel %vm826_vm1, %v762_v55, 0  ;;  %v761_v61 = vpack.c.bf16 %v716_v56, %v716_v56  ;;  %v2191_v56 = vld [vmem:[#allocation11 + $0xcc] ss:$16 sps:$4 sm:$0xff]   ;;  %v2186_v57 = vld [vmem:[#allocation11 + $0xc0] ss:$16 sps:$4 sm:$0xff]  }
 0x283   : > { %v718_v62 = vpop.f32.mrf.mxu0  ;;  %v2016_v63 = vpop.f32.mrf.mxu1  ;;  %2024 = vmatpush3.bf16.msra.mxu1 %v828_v60  ;;  %v2189_v58 = vld [vmem:[#allocation11 + $0xc8] ss:$16 sps:$4 sm:$0xff]  }
 0x284   : > { %v768_v1 = vsel %vm763_vm2, %v761_v61, 0  ;;  %874 = vrot.lane.b32.xlu1 %v761_v61, %s2531_s24  ;;  %2035 = vmatprep.subr.bf16.mxu1 %v2528_v3  ;;  %v2194_v62 = vld [vmem:[#allocation11 + $0xa4] ss:$16 sps:$4 sm:$0xff]   ;;  %v2197_v63 = vld [vmem:[#allocation11 + $0xac] ss:$16 sps:$4 sm:$0xff]  }
 0x285   : > { %2018 = vmatpush3.bf16.xpose.msra.mxu0 %v768_v1  ;;  %v2192_v1 = vld [vmem:[#allocation11 + $0xa0] ss:$16 sps:$4 sm:$0xff]  }
 0x286   : > { %2029 = vmatprep.subr.bf16.mxu0 %v2528_v3 }
 0x288   : > { %871 = vrot.lane.b32.xlu1 %v760_v2, %s2531_s24 }
 0x28c   : > { %2020 = vmatmul.mubr.msk.bf16.vlgmr.msra.gmra.mxu0 %vm763_vm2, %v760_v2  ;;  %v2195_v2 = vld [vmem:[#allocation11 + $0xa8] ss:$16 sps:$4 sm:$0xff]  }
 0x28d   : > { %2031 = vmatprep.mubr.msk.bf16.mxu0 %vm2530_vm0, %v2528_v3 }
 0x2f6   : > { %v875_v4 = vpop.permute.xlu1 %874 }
 0x2f7   : > { %v880_v5 = vsel %vm763_vm2, %v875_v4, 0  ;;  %v2198_v4 = vld [vmem:[#allocation11 + $0x80] ss:$16 sps:$4 sm:$0xff]  }
 0x2f8   : > { %2030 = vmatpush3.bf16.xpose.msra.mxu0 %v880_v5  ;;  %v2200_v5 = vld [vmem:[#allocation11 + $0x84] ss:$16 sps:$4 sm:$0xff]  }
 0x2fa   : > { %v872_v6 = vpop.permute.xlu1 %871 }
 0x2ff   : > { %2032 = vmatmul.mubr.msk.bf16.vlgmr.msra.gmra.mxu0 %vm763_vm2, %v872_v6  ;;  %v2201_v6 = vld [vmem:[#allocation11 + $0x88] ss:$16 sps:$4 sm:$0xff]  }
 0x300   : > { %1265 = vmatprep.mubr.bf16.mxu0 %v2529_v22 }
 0x34c   : > { %v804_v7 = vpop.f32.mrf.mxu0 }
 0x34d   : > { %v811_v8 = vsel %vm810_vm3, %v804_v7, -inf }
 0x34e   : > { %812 = vmax.xlane.f32.xlu0 %v811_v8  ;;  %v2021_v9 = vpop.f32.mrf.mxu0  ;;  %v2206_v8 = vld [vmem:[#allocation11 + $0x64] ss:$16 sps:$4 sm:$0xff]  }
 0x34f   : > { %v2209_v9 = vld [vmem:[#allocation11 + $0x6c] ss:$16 sps:$4 sm:$0xff]  }
 0x350   : > { %v807_v10 = vpop.f32.mrf.mxu0 }
 0x351   : > { %v2204_v10 = vld [vmem:[#allocation11 + $0x60] ss:$16 sps:$4 sm:$0xff]  }
 0x352   : > { %v2022_v11 = vpop.f32.mrf.mxu0 }
 0x353   : > { %v2207_v11 = vld [vmem:[#allocation11 + $0x68] ss:$16 sps:$4 sm:$0xff]  }
 0x3bf   : > { %v916_v12 = vpop.f32.mrf.mxu0 }
 0x3c0   : > { %v922_v13 = vsel %vm810_vm3, %v916_v12, -inf }
 0x3c1   : > { %923 = vmax.xlane.f32.xlu1 %v922_v13  ;;  %v2033_v14 = vpop.f32.mrf.mxu0  ;;  %v2215_v13 = vld [vmem:[#allocation11 + $0x4c] ss:$16 sps:$4 sm:$0xff]  }
 0x3c2   : > { %v2210_v14 = vld [vmem:[#allocation11 + $0x40] ss:$16 sps:$4 sm:$0xff]  }
 0x3c3   : > { %v919_v15 = vpop.f32.mrf.mxu0 }
 0x3c4   : > { %v2213_v15 = vld [vmem:[#allocation11 + $0x48] ss:$16 sps:$4 sm:$0xff]  }
 0x3c5   : > { %v2034_v16 = vpop.f32.mrf.mxu0 }
 0x3c6   : > { %v2218_v16 = vld [vmem:[#allocation11 + $0x24] ss:$16 sps:$4 sm:$0xff]  }
 0x3d7   : > { %v813_v17 = vpop.xlane.xlu0 %812 }
 0x3d8   : > { %v814_v18 = vsub.f32 %v804_v7, %v813_v17  ;;  %v2203_v7 = vld [vmem:[#allocation11 + $0x8c] ss:$16 sps:$4 sm:$0xff]  }
 0x3d9   : > { %v2221_v17 = vld [vmem:[#allocation11 + $0x2c] ss:$16 sps:$4 sm:$0xff]  }
 0x3da   : > { %v815_v19 = vmul.f32 1.442695, %v814_v18  ;;  %v2216_v18 = vld [vmem:[#allocation11 + $0x20] ss:$16 sps:$4 sm:$0xff]  }
 0x3dc   : > { %2262 = vpow2.f32 %v815_v19  ;;  %v2219_v19 = vld [vmem:[#allocation11 + $0x28] ss:$16 sps:$4 sm:$0xff]  }
 0x3e9   : > { %v2263_v20 = vpop.eup %2262 }
 0x3ea   : > { %v817_v21 = vsel %vm810_vm3, %v2263_v20, 0.0 }
 0x3eb   : > { %818 = vadd.xlane.f32.xlu0 %v817_v21  ;;  %v2227_v21 = vld [vmem:[#allocation11 + $0xc] ss:$16 sps:$4 sm:$0xff]  }
 0x44a   : > { %v924_v23 = vpop.xlane.xlu1 %923 }
 0x44b   : > { %v925_v24 = vsub.f32 %v916_v12, %v924_v23  ;;  %v2212_v12 = vld [vmem:[#allocation11 + $0x44] ss:$16 sps:$4 sm:$0xff]   ;;  %v2222_v23 = vld [vmem:[#allocation11] ss:$16 sps:$4 sm:$0xff]  }
 0x44d   : > { %v926_v25 = vmul.f32 1.442695, %v925_v24  ;;  %v2225_v24 = vld [vmem:[#allocation11 + $0x8] ss:$16 sps:$4 sm:$0xff]  }
 0x44f   : > { %2264 = vpow2.f32 %v926_v25  ;;  %v2228_v25 = vld [vmem:[#allocation12 + $0x78] sm:$0xff]  }
 0x45c   : > { %v2265_v26 = vpop.eup %2264 }
 0x45d   : > { %v928_v27 = vsel %vm810_vm3, %v2265_v26, 0.0 }
 0x45e   : > { %929 = vadd.xlane.f32.xlu0 %v928_v27 }
 0x474   : > { %v819_v28 = vpop.xlane.xlu0 %818  ;;  %935 = vrot.lane.b32.xlu0 %v762_v55, %s2531_s24  ;;  %v2188_v55 = vld [vmem:[#allocation11 + $0xc4] ss:$16 sps:$4 sm:$0xff]  }
 0x475   : > { %2266 = vrcp.f32 %v819_v28 }
 0x482   : > { %v2267_v29 = vpop.eup %2266 }
 0x483   : > { %v821_v30 = vmul.f32 %v2267_v29, %v2263_v20  ;;  %v2224_v20 = vld [vmem:[#allocation11 + $0x4] ss:$16 sps:$4 sm:$0xff]  }
 0x485   : > { %v822_v31 = vpack.c.bf16 %v821_v30, %v821_v30 }
 0x487   : > { %2026 = vmatmul.mubr.msk.bf16.vlgmr.msra.gmra.mxu1 %vm810_vm3, %v822_v31  ;;  %v1865_v31 = vld [vmem:[%s2896_s5] ss:$0 sm:$0xff] }
 0x488   : > { %2037 = vmatprep.mubr.msk.bf16.mxu1 %vm2530_vm0, %v2528_v3 }
 0x4e7   : > { %v930_v32 = vpop.xlane.xlu0 %929 }
 0x4e8   : > { %2268 = vrcp.f32 %v930_v32 }
 0x4eb   : > { %v936_v33 = vpop.permute.xlu0 %935 }
 0x4ec   : > { %v941_v34 = vsel %vm826_vm1, %v936_v33, 0  ;;  %v1866_v33 = vld [vmem:[%s2897_s6] ss:$0 sm:$0xff] }
 0x4ed   : > { %2036 = vmatpush3.bf16.msra.mxu1 %v941_v34 }
 0x4ee   : > { %1274 = vmatprep.subr.bf16.mxu1 %v2185_v54  ;;  %v2244_v54 = vld [vmem:[#allocation12 + $0x58] sm:$0xff]  }
 0x4f5   : > { %v2269_v35 = vpop.eup %2268 }
 0x4f6   : > { %v932_v36 = vmul.f32 %v2269_v35, %v2265_v26  ;;  %v2229_v26 = vld [vmem:[#allocation12 + $0xf8] sm:$0xff]  }
 0x4f8   : > { %v933_v37 = vpack.c.bf16 %v932_v36, %v932_v36  ;;  %v2230_v36 = vld [vmem:[#allocation12 + $0x38] sm:$0xff]  }
 0x4fa   : > { %2038 = vmatmul.mubr.msk.bf16.vlgmr.msra.gmra.mxu1 %vm810_vm3, %v933_v37  ;;  %v2231_v37 = vld [vmem:[#allocation12 + $0xb8] sm:$0xff]  }
 0x4fb   : > { %1306 = vmatprep.mubr.bf16.mxu1 %v2529_v22  ;;  %v2182_v22 = vld [vmem:[#allocation11 + $0xe4] ss:$16 sps:$4 sm:$0xff]   ;;  %1275 = vmatpush1.bf16.msra.mxu1 %v2183_v53 }
 0x4fc   : > { %1233 = vmatprep.subr.bf16.mxu0 %v2182_v22  ;;  %1276 = vmatprep.subr.bf16.mxu1 %v2191_v56  ;;  %v2242_v22 = vld [vmem:[#allocation12 + $0x20] sm:$0xff]   ;;  %v2246_v56 = vld [vmem:[#allocation12 + $0x18] sm:$0xff]  }
 0x4fd   : > { %1234 = vmatpush1.bf16.msra.mxu0 %v2180_v52  ;;  %v2241_v52 = vld [vmem:[#allocation12 + $0xe0] sm:$0xff]  }
 0x4fe   : > { %1235 = vmatprep.subr.bf16.mxu0 %v2188_v55  ;;  %v2243_v53 = vld [vmem:[#allocation12 + $0xa0] sm:$0xff]   ;;  %v2245_v55 = vld [vmem:[#allocation12 + $0xd8] sm:$0xff]  }
 0x4ff   : > { %1277 = vmatpush1.bf16.msra.mxu1 %v2189_v58  ;;  %v2248_v58 = vld [vmem:[#allocation12 + $0x50] sm:$0xff]  }
 0x500   : > { %1278 = vmatprep.subr.bf16.mxu1 %v2197_v63  ;;  %v2254_v63 = vld [vmem:[#allocation12 + $0x8] sm:$0xff]  }
 0x501   : > { %1236 = vmatpush1.bf16.msra.mxu0 %v2186_v57  ;;  %v2247_v57 = vld [vmem:[#allocation12 + $0x98] sm:$0xff]  }
 0x502   : > { %1237 = vmatprep.subr.bf16.mxu0 %v2194_v62  ;;  %v2253_v62 = vld [vmem:[#allocation12 + $0xc8] sm:$0xff]  }
 0x503   : > { %1279 = vmatpush1.bf16.msra.mxu1 %v2195_v2  ;;  %v2256_v2 = vld [vmem:[#allocation12 + $0x40] sm:$0xff]  }
 0x504   : > { %1280 = vmatprep.subr.bf16.mxu1 %v2203_v7  ;;  %v1051_v7 = vld [vmem:[%s2899_s8] sm:$0xf] }
 0x505   : > { %1238 = vmatpush1.bf16.msra.mxu0 %v2192_v1  ;;  %v2255_v1 = vld [vmem:[#allocation12 + $0x88] sm:$0xff]  }
 0x506   : > { %1239 = vmatprep.subr.bf16.mxu0 %v2200_v5  ;;  %v2258_v5 = vld [vmem:[#allocation12] sm:$0xff]  }
 0x507   : > { %1281 = vmatpush1.bf16.msra.mxu1 %v2201_v6  ;;  %v2259_v6 = vld [vmem:[#allocation12 + $0x80] sm:$0xff]  }
 0x508   : > { %1282 = vmatprep.subr.bf16.mxu1 %v2209_v9  ;;  %v1056_v9 = vrot.slane %v1051_v7, %v538_v46 }
 0x509   : > { %1240 = vmatpush1.bf16.msra.mxu0 %v2198_v4  ;;  %v2257_v4 = vld [vmem:[#allocation12 + $0xc0] sm:$0xff]  }
 0x50a   : > { %1241 = vmatprep.subr.bf16.mxu0 %v2206_v8  ;;  %v1067_v8 = vsub.s32 3, %v2790_v42 }
 0x50b   : > { %1283 = vmatpush1.bf16.msra.mxu1 %v2207_v11 }
 0x50c   : > { %1284 = vmatprep.subr.bf16.mxu1 %v2215_v13  ;;  %v1060_v13 = vrot.slane %v1051_v7, %v542_v45 }
 0x50d   : > { %1242 = vmatpush1.bf16.msra.mxu0 %v2204_v10  ;;  %v1064_v10 = vrot.slane %v1051_v7, %v546_v43 }
 0x50e   : > { %1243 = vmatprep.subr.bf16.mxu0 %v2212_v12 }
 0x50f   : > { %1285 = vmatpush1.bf16.msra.mxu1 %v2213_v15 }
 0x510   : > { %1286 = vmatprep.subr.bf16.mxu1 %v2221_v17 }
 0x511   : > { %1244 = vmatpush1.bf16.msra.mxu0 %v2210_v14  ;;  %v1068_v14 = vrot.slane %v1051_v7, %v1067_v8 }
 0x512   : > { %1245 = vmatprep.subr.bf16.mxu0 %v2218_v16 }
 0x513   : > { %1287 = vmatpush1.bf16.msra.mxu1 %v2219_v19 }
 0x514   : > { %1288 = vmatprep.subr.bf16.mxu1 %v2227_v21 }
 0x515   : > { %1246 = vmatpush1.bf16.msra.mxu0 %v2216_v18 }
 0x516   : > { %1247 = vmatprep.subr.bf16.mxu0 %v2224_v20 }
 0x517   : > { %1289 = vmatpush1.bf16.msra.mxu1 %v2225_v24 }
 0x518   : > { %1975 = vmatprep.subr.bf16.mxu1 %v2229_v26 }
 0x519   : > { %1248 = vmatpush1.bf16.msra.mxu0 %v2222_v23 }
 0x51a   : > { %1953 = vmatprep.subr.bf16.mxu0 %v2228_v25 }
 0x547   : > { %v864_v38 = vpop.f32.mrf.mxu1 }
 0x549   : > { %v2027_v39 = vpop.f32.mrf.mxu1 }
 0x54a   : > { %v2232_v39 = vld [vmem:[#allocation12 + $0x70] sm:$0xff]  }
 0x54b   : > { %v867_v40 = vpop.f32.mrf.mxu1 }
 0x54c   : > { %v2233_v40 = vld [vmem:[#allocation12 + $0xf0] sm:$0xff]  }
 0x54d   : > { %v2028_v41 = vpop.f32.mrf.mxu1 }
 0x54e   : > { %v2234_v41 = vld [vmem:[#allocation12 + $0x30] sm:$0xff]  }
 0x5ba   : > { %v977_v44 = vpop.f32.mrf.mxu1 }
 0x5bb   : > { %984 = vrot.lane.b32.xlu0 %v977_v44, %s2531_s24  ;;  %v2235_v44 = vld [vmem:[#allocation12 + $0xb0] sm:$0xff]   ;;  %s1697_s24 = scalar_lea.hbm %s2902_s11, %s1933_s13 }
 0x5bc   : > { %v2039_v3 = vpop.f32.mrf.mxu1 }
 0x5bd   : > { %v2236_v3 = vld [vmem:[#allocation12 + $0x68] sm:$0xff]  }
 0x5be   : > { %v980_v47 = vpop.f32.mrf.mxu1 }
 0x5bf   : > { %v2237_v47 = vld [vmem:[#allocation12 + $0xe8] sm:$0xff]  }
 0x5c0   : > { %v2040_v48 = vpop.f32.mrf.mxu1 }
 0x5c1   : > { %v2238_v48 = vld [vmem:[#allocation12 + $0x28] sm:$0xff]  }
 0x62d   : > { %v985_v49 = vpop.permute.xlu0 %984 }
 0x62e   : > { %v987_v50 = vsel %vm763_vm2, %v864_v38, %v985_v49  ;;  %v2239_v49 = vld [vmem:[#allocation12 + $0xa8] sm:$0xff]  }
 0x62f   : > { %v2830_v51 = vadd.f32 %v987_v50, %v2769_v0  ;;  %v2240_v50 = vld [vmem:[#allocation12 + $0x60] sm:$0xff]  }
 0x631   : > { %993 = vadd.xlane.f32.xlu1 %v2830_v51 }
 0x6ba   : > { %v994_v0 = vpop.xlane.xlu1 %993 }
 0x6bb   : > { %v995_v59 = vmul.f32 0.0078125, %v994_v0  ;;  %v2249_v0 = vld [vmem:[#allocation12 + $0xd0] sm:$0xff]  }
 0x6bd   : > { %v996_v60 = vsub.f32 %v2830_v51, %v995_v59  ;;  %v2250_v59 = vld [vmem:[#allocation12 + $0x10] sm:$0xff]  }
 0x6bf   : > { %v997_v61 = vmul.f32 %v996_v60, %v996_v60 }
 0x6c1   : > { %998 = vadd.xlane.f32.xlu0 %v997_v61  ;;  %v2252_v61 = vld [vmem:[#allocation12 + $0x48] sm:$0xff]  }
 0x74a   : > { %v999_v27 = vpop.xlane.xlu0 %998 }
 0x74b   : > { %v1000_v28 = vmul.f32 0.0078125, %v999_v27 }
 0x74d   : > { %v1001_v29 = vadd.f32 1e-05, %v1000_v28 }
 0x74f   : > { %2270 = vrsqrt.f32 %v1001_v29 }
 0x75c   : > { %v2271_v30 = vpop.eup %2270 }
 0x75d   : > { %v1003_v32 = vmul.f32 %v2271_v30, %v996_v60  ;;  %v2251_v60 = vld [vmem:[#allocation12 + $0x90] sm:$0xff]  }
 0x75f   : > { %v1010_v34 = vmul.f32 %v1865_v31, %v1003_v32 }
 0x761   : > { %v1017_v35 = vadd.f32 %v1866_v33, %v1010_v34 }
 0x763   : > { %v1018_v38 = vpack.c.bf16 %v1017_v35, %v1017_v35 }
 0x765   : > { %1266 = vmatmul.mubr.bf16.vlgmr.msra.gmra.mxu0 %v1018_v38  ;;  %1307 = vmatmul.mubr.bf16.vlgmr.msra.gmra.mxu1 %v1018_v38 }
 0x766   : > { %1954 = vmatpush3.bf16.msra.mxu0 %v2230_v36  ;;  %1976 = vmatpush3.bf16.msra.mxu1 %v2231_v37 }
 0x767   : > { %1955 = vmatprep.subr.bf16.mxu0 %v2232_v39  ;;  %1977 = vmatprep.subr.bf16.mxu1 %v2233_v40 }
 0x76a   : > { %1956 = vmatpush3.bf16.msra.mxu0 %v2234_v41  ;;  %1978 = vmatpush3.bf16.msra.mxu1 %v2235_v44 }
 0x76b   : > { %1957 = vmatprep.subr.bf16.mxu0 %v2236_v3  ;;  %1979 = vmatprep.subr.bf16.mxu1 %v2237_v47 }
 0x76e   : > { %1958 = vmatpush3.bf16.msra.mxu0 %v2238_v48  ;;  %1980 = vmatpush3.bf16.msra.mxu1 %v2239_v49 }
 0x76f   : > { %1959 = vmatprep.subr.bf16.mxu0 %v2240_v50  ;;  %1981 = vmatprep.subr.bf16.mxu1 %v2241_v52 }
 0x772   : > { %1960 = vmatpush3.bf16.msra.mxu0 %v2242_v22  ;;  %1982 = vmatpush3.bf16.msra.mxu1 %v2243_v53  ;;  %v1899_v53 = vld [vmem:[%s2901_s10] ss:$0 sm:$0xff] }
 0x773   : > { %1961 = vmatprep.subr.bf16.mxu0 %v2244_v54  ;;  %1983 = vmatprep.subr.bf16.mxu1 %v2245_v55 }
 0x776   : > { %1962 = vmatpush3.bf16.msra.mxu0 %v2246_v56  ;;  %1984 = vmatpush3.bf16.msra.mxu1 %v2247_v57 }
 0x777   : > { %1963 = vmatprep.subr.bf16.mxu0 %v2248_v58  ;;  %1985 = vmatprep.subr.bf16.mxu1 %v2249_v0  ;;  %v1342_v58 = vadd.f32 %v1899_v53, %v2830_v51 }
 0x77a   : > { %1964 = vmatpush3.bf16.msra.mxu0 %v2250_v59  ;;  %1986 = vmatpush3.bf16.msra.mxu1 %v2251_v60 }
 0x77b   : > { %1965 = vmatprep.subr.bf16.mxu0 %v2252_v61  ;;  %1987 = vmatprep.subr.bf16.mxu1 %v2253_v62 }
 0x77e   : > { %1966 = vmatpush3.bf16.msra.mxu0 %v2254_v63  ;;  %1988 = vmatpush3.bf16.msra.mxu1 %v2255_v1 }
 0x77f   : > { %1967 = vmatprep.subr.bf16.mxu0 %v2256_v2  ;;  %1989 = vmatprep.subr.bf16.mxu1 %v2257_v4 }
 0x782   : > { %1968 = vmatpush3.bf16.msra.mxu0 %v2258_v5  ;;  %1990 = vmatpush3.bf16.msra.mxu1 %v2259_v6 }
 0x825   : > { %v1267_v11 = vpop.f32.mrf.mxu0  ;;  %v1308_v12 = vpop.f32.mrf.mxu1 }
 0x826   : > { %v1268_v15 = vadd.f32 %v1267_v11, %v1056_v9  ;;  %v1309_v16 = vadd.f32 %v1308_v12, %v1064_v10 }
 0x827   : > { %v1269_v17 = vpop.f32.mrf.mxu0  ;;  %v1310_v18 = vpop.f32.mrf.mxu1 }
 0x828   : > { %v1319_v19 = vmul.f32 0.70710677, %v1268_v15  ;;  %v1321_v20 = vmul.f32 0.70710677, %v1309_v16  ;;  %v1270_v21 = vadd.f32 %v1269_v17, %v1060_v13  ;;  %v1311_v23 = vadd.f32 %v1310_v18, %v1068_v14 }
 0x829   : > { %v1271_v24 = vpop.f32.mrf.mxu0  ;;  %v1312_v25 = vpop.f32.mrf.mxu1  ;;  %v1315_v31 = vmul.f32 0.5, %v1268_v15  ;;  %v1317_v33 = vmul.f32 0.5, %v1309_v16 }
 0x82a   : > { %2272 = verf.f32 %v1319_v19  ;;  %v1320_v46 = vmul.f32 0.70710677, %v1270_v21  ;;  %v1322_v27 = vmul.f32 0.70710677, %v1311_v23  ;;  %v1316_v34 = vmul.f32 0.5, %v1270_v21 }
 0x82b   : > { %2274 = verf.f32 %v1321_v20  ;;  %v1272_v43 = vpop.f32.mrf.mxu0  ;;  %v1313_v26 = vpop.f32.mrf.mxu1  ;;  %v1318_v37 = vmul.f32 0.5, %v1311_v23 }
 0x82c   : > { %2276 = verf.f32 %v1320_v46 }
 0x82d   : > { %2278 = verf.f32 %v1322_v27 }
 0x837   : > { %v2273_v42 = vpop.eup %2272 }
 0x838   : > { %v2275_v45 = vpop.eup %2274  ;;  %v1327_v28 = vadd.f32 1.0, %v2273_v42 }
 0x839   : > { %v1329_v29 = vadd.f32 1.0, %v2275_v45  ;;  %v2277_v30 = vpop.eup %2276 }
 0x83a   : > { %v2279_v32 = vpop.eup %2278  ;;  %v1328_v35 = vadd.f32 1.0, %v2277_v30  ;;  %v1331_v36 = vmul.f32 %v1327_v28, %v1315_v31 }
 0x83b   : > { %v1330_v38 = vadd.f32 1.0, %v2279_v32  ;;  %v1333_v39 = vmul.f32 %v1329_v29, %v1317_v33 }
 0x83c   : > { %v1332_v40 = vmul.f32 %v1328_v35, %v1316_v34  ;;  %v1343_v3 = vpack.c.bf16 %v1331_v36, %v1331_v36 }
 0x83d   : > { %v1334_v41 = vmul.f32 %v1330_v38, %v1318_v37  ;;  %v1345_v48 = vpack.c.bf16 %v1333_v39, %v1333_v39 }
 0x83e   : > { %v1344_v44 = vpack.c.bf16 %v1332_v40, %v1332_v40 }
 0x83f   : > { %v1346_v47 = vpack.c.bf16 %v1334_v41, %v1334_v41 }
 0x840   : > { %1635 = vmatprep.mubr.bf16.mxu0 %v1344_v44 }
 0x841   : > { %1675 = vmatprep.mubr.bf16.mxu1 %v1346_v47  ;;  %1636 = vmatmul.mubr.bf16.vlgmr.msra.gmra.mxu0 %v1343_v3 }
 0x842   : > { %1676 = vmatmul.mubr.bf16.vlgmr.msra.gmra.mxu1 %v1345_v48 }
 0x901   : > { %v1969_v49 = vpop.f32.mrf.mxu0 }
 0x902   : > { %v1991_v50 = vpop.f32.mrf.mxu1 }
 0x903   : > { %v1970_v52 = vpop.f32.mrf.mxu0 }
 0x904   : > { %v1971_v22 = vadd.f32 %v1970_v52, %v1969_v49  ;;  %v1992_v54 = vpop.f32.mrf.mxu1 }
 0x905   : > { %v1993_v55 = vadd.f32 %v1992_v54, %v1991_v50  ;;  %v1972_v56 = vpop.f32.mrf.mxu0 }
 0x906   : > { %v1994_v57 = vpop.f32.mrf.mxu1 }
 0x907   : > { %v1678_v0 = vadd.f32 %v1993_v55, %v1971_v22  ;;  %v1973_v59 = vpop.f32.mrf.mxu0 }
 0x908   : > { %v1995_v60 = vpop.f32.mrf.mxu1 }
 0x909   : > { %v1683_v61 = vadd.f32 %v1678_v0, %v1342_v58 }
 0x90b   : > { %1684 = vst [vmem:[%s470_s9] sm:$0xff] %v1683_v61 }
 0x90c   : > { %2451 = shalt.err (!%p2448_p1)
}
 0x90d   : > { %s2452_s30 = scalar_lea.hbm %s1697_s24, 128  ;;  %s2456_s16 = scalar_lea.hbm %s2902_s11, 256 }
 0x90e   : > { %p2453_p3 = scmp.ne.s32.totalorder %s1697_s24, %s2452_s30  ;;  %p2457_p6 = scmp.lt.s32.totalorder %s1697_s24, %s2902_s11 }
 0x90f   : > { %p2458_p5 = scmp.lt.s32.totalorder %s2456_s16, %s2452_s30 }
 0x910   : > { %p2454_p4 = pnand %p2453_p3, %p2933_p10 }
 0x911   : > { %p2459_p7 = por %p2458_p5, %p2457_p6 }
 0x912   : > { %p2455_p12 = pneg %p2454_p4 }
 0x914   : > { %p2460_p8 = pnand %p2459_p7, %p2455_p12 }
 0x916   : > { %2463 = shalt.err (!%p2460_p8)
}
 0x917   : > { %2063 = dma.vmem_to_hbm [thread:$0]  (%p2933_p10), %s1700_s29, 128, %s1697_s24, %s1686_s27  }
 0x918 PF: > { %s1711_s13 = sand.u32 1, %s2502_s17   ;;  %p2934_p13 = scmp.ne.s32.totalorder %s2923_s14, 0 }
 0x919   : > { %p2935_p0 = scmp.ge.s32.totalorder %s2514_s20, 2  ;;  %s1712_s9 = scalar_lea.sflag [#allocation5], %s1711_s13 }
 0x91b   : > { %p2086_p2 = pnand %p2935_p0, %p2934_p13 }
 0x91d   : > { %p2087_p9 = pneg %p2086_p2 }
 0x91f   : > { %2497 = dma.done.wait (%p2087_p9), %s1712_s9, 128  }
 0x920   : > { %2499 = vsyncadd (%p2087_p9), %s1712_s9, 4294967168  ;;  %s2936_s1 = sld [smem:[#allocation20_spill]]  ;;  %p27_p11 = scmp.ge.s32.totalorder %s2690_s22, 4  }
 0x921   : > { %s2937_s17 = smov %s2506_s18  ;;  %s2938_s18 = smov %s2510_s19 }
 0x922   : > { %s2940_s20 = smov %s2690_s22  ;;  %29 = sbr.rel (!%p27_p11) target bundleno = 14 (0xe), region = 129 }
 0x926   : > { %s2939_s19 = smov %s2936_s1 }
 0x927   :  { %1717 = vsyncpa [#allocation4], 1 }
 0x928   :  { %1719 = vsyncpa [#allocation4 + $0x1], 1 }
 0x929   :  { %1720 = vsyncpa [#allocation7], 1 }
 0x92a   :  { %1721 = vsyncpa [#allocation10], 1 }
 0x92b   :  { %1722 = vsyncpa [#allocation13], 1 }
 0x92c   :  { %1723 = vsyncpa [#allocation5], 1 }
 0x92d   :  { %1725 = vsyncpa [#allocation5 + $0x1], 1 }

</bundles_post_ra>
